<compile_context>
chip_gen: v6e
topology: v6e:2x2x1
jax: 0.10.0
libtpu: 0.0.40
codegen_flags: <defaults>
</compile_context>

<pallas_src>
import jax
import jax.numpy as jnp
from jax.experimental import pallas as pl
from jax.experimental.pallas import tpu as pltpu


LANE = 128  # TPU lane width; all padded feature / node dims are multiples of this.

_VMEM_SPEC = pl.BlockSpec(memory_space=pltpu.MemorySpace.VMEM)


def _round_up(x, m):
    return ((x + m - 1) // m) * m


# ---------------------------------------------------------------------------
# Fused Pallas kernel: 4x (GCNConv -> tanh) + Linear head, all in VMEM.
# ---------------------------------------------------------------------------
def _fused_gcn_kernel(a_ref, x_ref,
                      w0_ref, b0_ref,
                      w1_ref, b1_ref,
                      w2_ref, b2_ref,
                      w3_ref, b3_ref,
                      wo_ref, bo_ref,
                      o_ref):
    a = a_ref[...]          # [Np, Np] normalized adjacency, resident once
    h = x_ref[...]          # [Np, 128] padded node features

    def gcn_layer(h, w_ref, b_ref):
        # H_out = tanh( A_hat @ (H @ W) + b ), f32 accumulation on both dots.
        xw = jnp.dot(h, w_ref[...], preferred_element_type=jnp.float32)
        return jnp.tanh(
            jnp.dot(a, xw, preferred_element_type=jnp.float32) + b_ref[...]
        )

    h = gcn_layer(h, w0_ref, b0_ref)
    h = gcn_layer(h, w1_ref, b1_ref)
    h = gcn_layer(h, w2_ref, b2_ref)
    h = gcn_layer(h, w3_ref, b3_ref)

    y = jnp.dot(h, wo_ref[...], preferred_element_type=jnp.float32) + bo_ref[...]
    o_ref[...] = y.astype(o_ref.dtype)


# ---------------------------------------------------------------------------
# Graph preprocessing (plain-JAX glue, matches GCNConv default normalization)
# ---------------------------------------------------------------------------
def build_norm_adj(edge_index, num_nodes):
    """D^-1/2 (A + I) D^-1/2 as a dense [N, N] float32 matrix.

    Uses scatter-add so duplicate edges are counted (like PyG's per-edge
    weight of 1), and only adds self-loops to nodes that don't have one
    (add_remaining_self_loops semantics).
    """
    src, dst = edge_index[0], edge_index[1]
    a = jnp.zeros((num_nodes, num_nodes), jnp.float32)
    # message flows src -> dst  (row = destination, col = source)
    a = a.at[dst, src].add(1.0)
    diag = jnp.diagonal(a)
    a = a + jnp.diag(jnp.where(diag > 0, 0.0, 1.0))  # remaining self-loops
    deg = a.sum(axis=1)
    d_inv_sqrt = jnp.where(deg > 0, 1.0 / jnp.sqrt(deg), 0.0)
    return d_inv_sqrt[:, None] * a * d_inv_sqrt[None, :]


# ---------------------------------------------------------------------------
# Model: parameters + forward
# ---------------------------------------------------------------------------
def _glorot(key, shape):
    limit = jnp.sqrt(6.0 / (shape[0] + shape[1]))
    return jax.random.uniform(key, shape, jnp.float32, -limit, limit)


def init_gcn_params(key, input_dim, hidden_dim, output_dim):
    ks = jax.random.split(key, 6)
    return {
        "initial_conv": {"w": _glorot(ks[0], (input_dim, hidden_dim)),
                         "b": jnp.zeros((hidden_dim,), jnp.float32)},
        "conv1": {"w": _glorot(ks[1], (hidden_dim, hidden_dim)),
                  "b": jnp.zeros((hidden_dim,), jnp.float32)},
        "conv2": {"w": _glorot(ks[2], (hidden_dim, hidden_dim)),
                  "b": jnp.zeros((hidden_dim,), jnp.float32)},
        "conv3": {"w": _glorot(ks[3], (hidden_dim, hidden_dim)),
                  "b": jnp.zeros((hidden_dim,), jnp.float32)},
        "out": {"w": _glorot(ks[4], (hidden_dim, output_dim)),
                "b": jax.random.uniform(ks[5], (output_dim,), jnp.float32,
                                        -1.0 / jnp.sqrt(hidden_dim),
                                        1.0 / jnp.sqrt(hidden_dim))},
    }


def _pad2(x, rows, cols):
    r, c = x.shape
    return jnp.pad(x, ((0, rows - r), (0, cols - c)))


def gcn_forward(params, x, edge_index):
    """Mirrors Gcn.forward: 4x (GCNConv -> tanh), then Linear head."""
    n, _ = x.shape
    out_dim = params["out"]["w"].shape[1]

    # Lane-dense padding: nodes -> multiple of 128 (A_hat's last dim is the
    # lane axis), features/output -> exactly one 128-lane tile.  Zero padding
    # keeps padded rows/cols inert (padded A rows/cols are zero, padded weight
    # rows/cols and bias entries are zero), so the real [N, out_dim] corner is
    # exact.
    n_pad = _round_up(n, LANE)
    f_pad = LANE

    a_hat = build_norm_adj(edge_index, n)
    a_p = _pad2(a_hat, n_pad, n_pad)
    x_p = _pad2(x, n_pad, f_pad)

    def pw(w):
        return _pad2(w, f_pad, f_pad)

    def pb(b):
        return _pad2(b.reshape(1, -1), 1, f_pad)

    args = [
        a_p, x_p,
        pw(params["initial_conv"]["w"]), pb(params["initial_conv"]["b"]),
        pw(params["conv1"]["w"]), pb(params["conv1"]["b"]),
        pw(params["conv2"]["w"]), pb(params["conv2"]["b"]),
        pw(params["conv3"]["w"]), pb(params["conv3"]["b"]),
        pw(params["out"]["w"]), pb(params["out"]["b"]),
    ]

    out_pad = pl.pallas_call(
        _fused_gcn_kernel,
        out_shape=jax.ShapeDtypeStruct((n_pad, f_pad), jnp.float32),
        in_specs=[_VMEM_SPEC] * len(args),
        out_specs=_VMEM_SPEC,
    )(*args)

    return out_pad[:n, :out_dim]


# ---------------------------------------------------------------------------
# Main
# ---------------------------------------------------------------------------
if __name__ == "__main__":
    INPUT_DIM, HIDDEN_DIM, OUTPUT_DIM = 16, 32, 4
    NUM_NODES, NUM_EDGES = 24, 48

    key = jax.random.PRNGKey(0)
    k_x, k_e, k_p = jax.random.split(key, 3)

    # Node features (data.x)
    x = jax.random.normal(k_x, (NUM_NODES, INPUT_DIM), jnp.float32)

    # Random undirected edge_index [2, E*2], no self-loops (data.edge_index)
    src = jax.random.randint(k_e, (NUM_EDGES,), 0, NUM_NODES)
    dst = (src + 1 + jax.random.randint(jax.random.fold_in(k_e, 1),
                                        (NUM_EDGES,), 0, NUM_NODES - 1)) % NUM_NODES
    edge_index = jnp.stack([jnp.concatenate([src, dst]),
                            jnp.concatenate([dst, src])], axis=0)

    # batch_index (data.batch) is unpacked but unused in forward()
    batch_index = jnp.zeros((NUM_NODES,), jnp.int32)  # noqa: F841

    params = init_gcn_params(k_p, INPUT_DIM, HIDDEN_DIM, OUTPUT_DIM)

    forward = jax.jit(gcn_forward)
    out = forward(params, x, edge_index)
    jax.block_until_ready(out)

    assert out.shape == (NUM_NODES, OUTPUT_DIM)
    assert bool(jnp.all(jnp.isfinite(out)))
    print("KERNEL_OK")
</pallas_src>

<mosaic_0001>
module attributes {stable_mosaic.version = 11 : i64} {
  func.func private @main(%arg0: i32) attributes {dimension_semantics = [#tpu.dimension_semantics<core_parallel>], iteration_bounds = array<i64: 2>, tpu.core_type = #tpu.core_type<sc_scalar_subcore>, window_params = []} {
    return
  }
}

module attributes {stable_mosaic.version = 11 : i64} {
  func.func private @main(%arg0: i32) attributes {dimension_semantics = [#tpu.dimension_semantics<core_parallel>], iteration_bounds = array<i64: 2>, tpu.core_type = #tpu.core_type<sc_scalar_subcore>, window_params = []} {
    return
  }
}

module attributes {stable_mosaic.version = 11 : i64} {
  func.func @_fused_gcn_kernel(%arg0: memref<128x128xf32, #tpu.memory_space<vmem>>, %arg1: memref<128x128xf32, #tpu.memory_space<vmem>>, %arg2: memref<128x128xf32, #tpu.memory_space<vmem>>, %arg3: memref<1x128xf32, #tpu.memory_space<vmem>>, %arg4: memref<128x128xf32, #tpu.memory_space<vmem>>, %arg5: memref<1x128xf32, #tpu.memory_space<vmem>>, %arg6: memref<128x128xf32, #tpu.memory_space<vmem>>, %arg7: memref<1x128xf32, #tpu.memory_space<vmem>>, %arg8: memref<128x128xf32, #tpu.memory_space<vmem>>, %arg9: memref<1x128xf32, #tpu.memory_space<vmem>>, %arg10: memref<128x128xf32, #tpu.memory_space<vmem>>, %arg11: memref<1x128xf32, #tpu.memory_space<vmem>>, %arg12: memref<128x128xf32, #tpu.memory_space<vmem>>) attributes {dimension_semantics = [], scalar_prefetch = 0 : i64, scratch_operands = 0 : i64, tpu.core_type = #tpu.core_type<tc>} {
    %c0 = arith.constant 0 : index
    %c0_0 = arith.constant 0 : index
    %0 = vector.load %arg0[%c0, %c0_0] : memref<128x128xf32, #tpu.memory_space<vmem>>, vector<128x128xf32>
    %c0_1 = arith.constant 0 : index
    %c0_2 = arith.constant 0 : index
    %1 = vector.load %arg1[%c0_1, %c0_2] : memref<128x128xf32, #tpu.memory_space<vmem>>, vector<128x128xf32>
    %c0_3 = arith.constant 0 : index
    %c0_4 = arith.constant 0 : index
    %2 = vector.load %arg2[%c0_3, %c0_4] : memref<128x128xf32, #tpu.memory_space<vmem>>, vector<128x128xf32>
    %cst = arith.constant dense<0.000000e+00> : vector<128x128xf32>
    %3 = tpu.matmul %1, %2, %cst {dimension_numbers = #tpu.dot_dimension_numbers<[1], [0], [0], [1], [0, 0, 1, 1], [], []>} : vector<128x128xf32>, vector<128x128xf32>, vector<128x128xf32> -> vector<128x128xf32>
    %cst_5 = arith.constant dense<0.000000e+00> : vector<128x128xf32>
    %4 = tpu.matmul %0, %3, %cst_5 {dimension_numbers = #tpu.dot_dimension_numbers<[1], [0], [0], [1], [0, 0, 1, 1], [], []>} : vector<128x128xf32>, vector<128x128xf32>, vector<128x128xf32> -> vector<128x128xf32>
    %c0_6 = arith.constant 0 : index
    %c0_7 = arith.constant 0 : index
    %5 = vector.load %arg3[%c0_6, %c0_7] : memref<1x128xf32, #tpu.memory_space<vmem>>, vector<1x128xf32>
    %6 = vector.broadcast %5 : vector<1x128xf32> to vector<128x128xf32>
    %7 = arith.addf %4, %6 : vector<128x128xf32>
    %8 = math.tanh %7 : vector<128x128xf32>
    %c0_8 = arith.constant 0 : index
    %c0_9 = arith.constant 0 : index
    %9 = vector.load %arg4[%c0_8, %c0_9] : memref<128x128xf32, #tpu.memory_space<vmem>>, vector<128x128xf32>
    %cst_10 = arith.constant dense<0.000000e+00> : vector<128x128xf32>
    %10 = tpu.matmul %8, %9, %cst_10 {dimension_numbers = #tpu.dot_dimension_numbers<[1], [0], [0], [1], [0, 0, 1, 1], [], []>} : vector<128x128xf32>, vector<128x128xf32>, vector<128x128xf32> -> vector<128x128xf32>
    %cst_11 = arith.constant dense<0.000000e+00> : vector<128x128xf32>
    %11 = tpu.matmul %0, %10, %cst_11 {dimension_numbers = #tpu.dot_dimension_numbers<[1], [0], [0], [1], [0, 0, 1, 1], [], []>} : vector<128x128xf32>, vector<128x128xf32>, vector<128x128xf32> -> vector<128x128xf32>
    %c0_12 = arith.constant 0 : index
    %c0_13 = arith.constant 0 : index
    %12 = vector.load %arg5[%c0_12, %c0_13] : memref<1x128xf32, #tpu.memory_space<vmem>>, vector<1x128xf32>
    %13 = vector.broadcast %12 : vector<1x128xf32> to vector<128x128xf32>
    %14 = arith.addf %11, %13 : vector<128x128xf32>
    %15 = math.tanh %14 : vector<128x128xf32>
    %c0_14 = arith.constant 0 : index
    %c0_15 = arith.constant 0 : index
    %16 = vector.load %arg6[%c0_14, %c0_15] : memref<128x128xf32, #tpu.memory_space<vmem>>, vector<128x128xf32>
    %cst_16 = arith.constant dense<0.000000e+00> : vector<128x128xf32>
    %17 = tpu.matmul %15, %16, %cst_16 {dimension_numbers = #tpu.dot_dimension_numbers<[1], [0], [0], [1], [0, 0, 1, 1], [], []>} : vector<128x128xf32>, vector<128x128xf32>, vector<128x128xf32> -> vector<128x128xf32>
    %cst_17 = arith.constant dense<0.000000e+00> : vector<128x128xf32>
    %18 = tpu.matmul %0, %17, %cst_17 {dimension_numbers = #tpu.dot_dimension_numbers<[1], [0], [0], [1], [0, 0, 1, 1], [], []>} : vector<128x128xf32>, vector<128x128xf32>, vector<128x128xf32> -> vector<128x128xf32>
    %c0_18 = arith.constant 0 : index
    %c0_19 = arith.constant 0 : index
    %19 = vector.load %arg7[%c0_18, %c0_19] : memref<1x128xf32, #tpu.memory_space<vmem>>, vector<1x128xf32>
    %20 = vector.broadcast %19 : vector<1x128xf32> to vector<128x128xf32>
    %21 = arith.addf %18, %20 : vector<128x128xf32>
    %22 = math.tanh %21 : vector<128x128xf32>
    %c0_20 = arith.constant 0 : index
    %c0_21 = arith.constant 0 : index
    %23 = vector.load %arg8[%c0_20, %c0_21] : memref<128x128xf32, #tpu.memory_space<vmem>>, vector<128x128xf32>
    %cst_22 = arith.constant dense<0.000000e+00> : vector<128x128xf32>
    %24 = tpu.matmul %22, %23, %cst_22 {dimension_numbers = #tpu.dot_dimension_numbers<[1], [0], [0], [1], [0, 0, 1, 1], [], []>} : vector<128x128xf32>, vector<128x128xf32>, vector<128x128xf32> -> vector<128x128xf32>
    %cst_23 = arith.constant dense<0.000000e+00> : vector<128x128xf32>
    %25 = tpu.matmul %0, %24, %cst_23 {dimension_numbers = #tpu.dot_dimension_numbers<[1], [0], [0], [1], [0, 0, 1, 1], [], []>} : vector<128x128xf32>, vector<128x128xf32>, vector<128x128xf32> -> vector<128x128xf32>
    %c0_24 = arith.constant 0 : index
    %c0_25 = arith.constant 0 : index
    %26 = vector.load %arg9[%c0_24, %c0_25] : memref<1x128xf32, #tpu.memory_space<vmem>>, vector<1x128xf32>
    %27 = vector.broadcast %26 : vector<1x128xf32> to vector<128x128xf32>
    %28 = arith.addf %25, %27 : vector<128x128xf32>
    %29 = math.tanh %28 : vector<128x128xf32>
    %c0_26 = arith.constant 0 : index
    %c0_27 = arith.constant 0 : index
    %30 = vector.load %arg10[%c0_26, %c0_27] : memref<128x128xf32, #tpu.memory_space<vmem>>, vector<128x128xf32>
    %cst_28 = arith.constant dense<0.000000e+00> : vector<128x128xf32>
    %31 = tpu.matmul %29, %30, %cst_28 {dimension_numbers = #tpu.dot_dimension_numbers<[1], [0], [0], [1], [0, 0, 1, 1], [], []>} : vector<128x128xf32>, vector<128x128xf32>, vector<128x128xf32> -> vector<128x128xf32>
    %c0_29 = arith.constant 0 : index
    %c0_30 = arith.constant 0 : index
    %32 = vector.load %arg11[%c0_29, %c0_30] : memref<1x128xf32, #tpu.memory_space<vmem>>, vector<1x128xf32>
    %33 = vector.broadcast %32 : vector<1x128xf32> to vector<128x128xf32>
    %34 = arith.addf %31, %33 : vector<128x128xf32>
    %c0_31 = arith.constant 0 : index
    %c0_32 = arith.constant 0 : index
    %35 = vector.load %arg12[%c0_31, %c0_32] : memref<128x128xf32, #tpu.memory_space<vmem>>, vector<128x128xf32>
    tpu.vector_store %arg12[%c0_31, %c0_32], %34 {strides = array<i32>} : memref<128x128xf32, #tpu.memory_space<vmem>>, vector<128x128xf32>,
    return
  }
}

</mosaic_0001>

<bundles_post_ra>
// kernel: gcn_forward.1
= control target key start
LH: loop header
LB: loop body
LE: loop exit
PB: predicated region body
PF: predicated region fallthrough
CT: control target
= control target key end

     0   :  { %s3175_s2 = inlined_call_operand.vmem [shape: f32[128,128], index: 2, kind: input, shape index: {}]   ;;  %s3176_s1 = inlined_call_operand.vmem [shape: f32[128,128], index: 1, kind: input, shape index: {}]   ;;  %s3177_s0 = inlined_call_operand.vmem [shape: f32[128,128], index: 0, kind: input, shape index: {}]   ;;  %s3178_s4 = inlined_call_operand.vmem [shape: f32[128,128], index: 4, kind: input, shape index: {}]   ;;  %s3179_s3 = inlined_call_operand.vmem [shape: f32[1,128], index: 3, kind: input, shape index: {}]   ;;  %s3180_s6 = inlined_call_operand.vmem [shape: f32[128,128], index: 6, kind: input, shape index: {}]   ;;  %s3181_s5 = inlined_call_operand.vmem [shape: f32[1,128], index: 5, kind: input, shape index: {}]   ;;  %s3182_s8 = inlined_call_operand.vmem [shape: f32[128,128], index: 8, kind: input, shape index: {}]   ;;  %s3183_s7 = inlined_call_operand.vmem [shape: f32[1,128], index: 7, kind: input, shape index: {}]   ;;  %s3184_s10 = inlined_call_operand.vmem [shape: f32[128,128], index: 10, kind: input, shape index: {}]   ;;  %s3185_s9 = inlined_call_operand.vmem [shape: f32[1,128], index: 9, kind: input, shape index: {}]   ;;  %s3186_s11 = inlined_call_operand.vmem [shape: f32[1,128], index: 11, kind: input, shape index: {}]   ;;  %s3187_s12 = inlined_call_operand.vmem [shape: f32[128,128], index: 12, kind: output, shape index: {}]  }
   0x1   :  { %v88_v0 = vld [vmem:[%s3175_s2 + $0x78] sm:$0xff]  ;;  %v87_v1 = vld [vmem:[%s3175_s2 + $0x70] sm:$0xff]  ;;  %v86_v2 = vld [vmem:[%s3175_s2 + $0x68] sm:$0xff] }
   0x2   :  { %1870 = vmatprep.subr.mxu0 %v88_v0  ;;  %v85_v3 = vld [vmem:[%s3175_s2 + $0x60] sm:$0xff]  ;;  %v84_v5 = vld [vmem:[%s3175_s2 + $0x58] sm:$0xff]  ;;  %v83_v6 = vld [vmem:[%s3175_s2 + $0x50] sm:$0xff] }
   0x3   :  { %1871 = vmatpush3.msra.mxu0 %v88_v0  ;;  %v57_v4 = vld [vmem:[%s3176_s1] sm:$0xff]  ;;  %v82_v7 = vld [vmem:[%s3175_s2 + $0x48] sm:$0xff]  ;;  %v80_v9 = vld [vmem:[%s3175_s2 + $0x38] sm:$0xff] }
   0x4   :  { %1872 = vmatprep.subr.mxu0 %v87_v1  ;;  %1902 = vmatprep.mubr.f32.mxu0 %v57_v4  ;;  %v81_v8 = vld [vmem:[%s3175_s2 + $0x40] sm:$0xff]  ;;  %v79_v10 = vld [vmem:[%s3175_s2 + $0x30] sm:$0xff]  ;;  %v78_v11 = vld [vmem:[%s3175_s2 + $0x28] sm:$0xff] }
   0x5   :  { %1873 = vmatpush3.msra.mxu0 %v87_v1  ;;  %v77_v12 = vld [vmem:[%s3175_s2 + $0x20] sm:$0xff]  ;;  %v76_v13 = vld [vmem:[%s3175_s2 + $0x18] sm:$0xff]  ;;  %v75_v14 = vld [vmem:[%s3175_s2 + $0x10] sm:$0xff] }
   0x6   :  { %1874 = vmatprep.subr.mxu0 %v86_v2  ;;  %v74_v15 = vld [vmem:[%s3175_s2 + $0x8] sm:$0xff]  ;;  %v73_v16 = vld [vmem:[%s3175_s2] sm:$0xff]  ;;  %v59_v18 = vld [vmem:[%s3176_s1 + $0x10] sm:$0xff] }
   0x7   :  { %1875 = vmatpush3.msra.mxu0 %v86_v2  ;;  %v58_v17 = vld [vmem:[%s3176_s1 + $0x8] sm:$0xff]  ;;  %v60_v19 = vld [vmem:[%s3176_s1 + $0x18] sm:$0xff]  ;;  %v61_v20 = vld [vmem:[%s3176_s1 + $0x20] sm:$0xff] }
   0x8   :  { %1876 = vmatprep.subr.mxu0 %v85_v3  ;;  %v62_v21 = vld [vmem:[%s3176_s1 + $0x28] sm:$0xff]  ;;  %v63_v22 = vld [vmem:[%s3176_s1 + $0x30] sm:$0xff]  ;;  %v64_v23 = vld [vmem:[%s3176_s1 + $0x38] sm:$0xff] }
   0x9   :  { %1877 = vmatpush3.msra.mxu0 %v85_v3  ;;  %v65_v24 = vld [vmem:[%s3176_s1 + $0x40] sm:$0xff]  ;;  %v66_v25 = vld [vmem:[%s3176_s1 + $0x48] sm:$0xff]  ;;  %v67_v26 = vld [vmem:[%s3176_s1 + $0x50] sm:$0xff] }
   0xa   :  { %1878 = vmatprep.subr.mxu0 %v84_v5  ;;  %v68_v27 = vld [vmem:[%s3176_s1 + $0x58] sm:$0xff]  ;;  %v69_v28 = vld [vmem:[%s3176_s1 + $0x60] sm:$0xff]  ;;  %v70_v29 = vld [vmem:[%s3176_s1 + $0x68] sm:$0xff] }
   0xb   :  { %1879 = vmatpush3.msra.mxu0 %v84_v5  ;;  %v71_v30 = vld [vmem:[%s3176_s1 + $0x70] sm:$0xff]  ;;  %v72_v31 = vld [vmem:[%s3176_s1 + $0x78] sm:$0xff]  ;;  %v2713_v32 = vld [vmem:[%s3177_s0] sm:$0xff] }
   0xc   :  { %1880 = vmatprep.subr.mxu0 %v83_v6  ;;  %1958 = vmatprep.mubr.f32.mxu1 %v2713_v32  ;;  %v417_v33 = vld [vmem:[%s3178_s4 + $0x78] sm:$0xff]  ;;  %v416_v34 = vld [vmem:[%s3178_s4 + $0x70] sm:$0xff]  ;;  %v415_v35 = vld [vmem:[%s3178_s4 + $0x68] sm:$0xff] }
   0xd   :  { %1881 = vmatpush3.msra.mxu0 %v83_v6  ;;  %v414_v36 = vld [vmem:[%s3178_s4 + $0x60] sm:$0xff]  ;;  %v413_v37 = vld [vmem:[%s3178_s4 + $0x58] sm:$0xff]  ;;  %v412_v38 = vld [vmem:[%s3178_s4 + $0x50] sm:$0xff] }
   0xe   :  { %1882 = vmatprep.subr.mxu0 %v82_v7  ;;  %v2737_v55 = vld [vmem:[%s3177_s0 + $0x8] sm:$0xff]  ;;  %v2742_v56 = vld [vmem:[%s3177_s0 + $0x10] sm:$0xff]  ;;  %v2749_v57 = vld [vmem:[%s3177_s0 + $0x18] sm:$0xff] }
   0xf   :  { %1883 = vmatpush3.msra.mxu0 %v82_v7  ;;  %v2754_v58 = vld [vmem:[%s3177_s0 + $0x20] sm:$0xff]  ;;  %v2761_v59 = vld [vmem:[%s3177_s0 + $0x28] sm:$0xff]  ;;  %v2766_v60 = vld [vmem:[%s3177_s0 + $0x30] sm:$0xff] }
  0x10   :  { %1884 = vmatprep.subr.mxu0 %v81_v8  ;;  %v2773_v61 = vld [vmem:[%s3177_s0 + $0x38] sm:$0xff]  ;;  %v2778_v62 = vld [vmem:[%s3177_s0 + $0x40] sm:$0xff]  ;;  %v2785_v63 = vld [vmem:[%s3177_s0 + $0x48] sm:$0xff] }
  0x11   :  { %1885 = vmatpush3.msra.mxu0 %v81_v8  ;;  %v2790_v0 = vld [vmem:[%s3177_s0 + $0x50] sm:$0xff]  ;;  %v2797_v1 = vld [vmem:[%s3177_s0 + $0x58] sm:$0xff]  ;;  %v2802_v2 = vld [vmem:[%s3177_s0 + $0x60] sm:$0xff] }
  0x12   :  { %1886 = vmatprep.subr.mxu0 %v80_v9  ;;  %v2809_v3 = vld [vmem:[%s3177_s0 + $0x68] sm:$0xff]  ;;  %v2814_v4 = vld [vmem:[%s3177_s0 + $0x70] sm:$0xff]  ;;  %v2821_v5 = vld [vmem:[%s3177_s0 + $0x78] sm:$0xff] }
  0x13   :  { %1887 = vmatpush3.msra.mxu0 %v80_v9  ;;  %v411_v6 = vld [vmem:[%s3178_s4 + $0x48] sm:$0xff]  ;;  %v410_v7 = vld [vmem:[%s3178_s4 + $0x40] sm:$0xff]  ;;  %v409_v8 = vld [vmem:[%s3178_s4 + $0x38] sm:$0xff] }
  0x14   :  { %1888 = vmatprep.subr.mxu0 %v79_v10  ;;  %v408_v9 = vld [vmem:[%s3178_s4 + $0x30] sm:$0xff] }
  0x15   :  { %1889 = vmatpush3.msra.mxu0 %v79_v10  ;;  %v407_v10 = vld [vmem:[%s3178_s4 + $0x28] sm:$0xff] }
  0x16   :  { %1890 = vmatprep.subr.mxu0 %v78_v11 }
  0x17   :  { %1891 = vmatpush3.msra.mxu0 %v78_v11  ;;  %v406_v11 = vld [vmem:[%s3178_s4 + $0x20] sm:$0xff] }
  0x18   :  { %1892 = vmatprep.subr.mxu0 %v77_v12 }
  0x19   :  { %1893 = vmatpush3.msra.mxu0 %v77_v12  ;;  %v405_v12 = vld [vmem:[%s3178_s4 + $0x18] sm:$0xff] }
  0x1a   :  { %1894 = vmatprep.subr.mxu0 %v76_v13 }
  0x1b   :  { %1895 = vmatpush3.msra.mxu0 %v76_v13  ;;  %v404_v13 = vld [vmem:[%s3178_s4 + $0x10] sm:$0xff] }
  0x1c   :  { %1896 = vmatprep.subr.mxu0 %v75_v14 }
  0x1d   :  { %1897 = vmatpush3.msra.mxu0 %v75_v14  ;;  %v403_v14 = vld [vmem:[%s3178_s4 + $0x8] sm:$0xff] }
  0x1e   :  { %1898 = vmatprep.subr.mxu0 %v74_v15 }
  0x1f   :  { %1899 = vmatpush3.msra.mxu0 %v74_v15  ;;  %v402_v15 = vld [vmem:[%s3178_s4] sm:$0xff] }
  0x20   :  { %1900 = vmatprep.subr.mxu0 %v73_v16 }
  0x21   :  { %1901 = vmatpush3.msra.mxu0 %v73_v16  ;;  %v1577_v16 = vld [vmem:[%s3179_s3] ss:$0 sm:$0xff] }
  0x22   :  { %1903 = vmatmul.mubr.f32.vlgmr.msra.gmra.mxu0 %v58_v17  ;;  %1982 = vmatprep.subr.mxu0 %v417_v33 }
  0x23   :  { %1905 = vmatprep.mubr.f32.mxu0 %v59_v18  ;;  %1983 = vmatpush3.msra.mxu0 %v417_v33 }
  0x24   :  { %1984 = vmatprep.subr.mxu0 %v416_v34 }
  0x25   :  { %1985 = vmatpush3.msra.mxu0 %v416_v34 }
  0x26   :  { %1906 = vmatmul.mubr.f32.gmra.mxu0 %v60_v19  ;;  %1986 = vmatprep.subr.mxu0 %v415_v35 }
  0x27   :  { %1908 = vmatprep.mubr.f32.mxu0 %v61_v20  ;;  %1987 = vmatpush3.msra.mxu0 %v415_v35 }
  0x28   :  { %1988 = vmatprep.subr.mxu0 %v414_v36 }
  0x29   :  { %1989 = vmatpush3.msra.mxu0 %v414_v36 }
  0x2a   :  { %1909 = vmatmul.mubr.f32.gmra.mxu0 %v62_v21  ;;  %1990 = vmatprep.subr.mxu0 %v413_v37 }
  0x2b   :  { %1911 = vmatprep.mubr.f32.mxu0 %v63_v22  ;;  %1991 = vmatpush3.msra.mxu0 %v413_v37 }
  0x2c   :  { %1992 = vmatprep.subr.mxu0 %v412_v38 }
  0x2d   :  { %1993 = vmatpush3.msra.mxu0 %v412_v38 }
  0x2e   :  { %1912 = vmatmul.mubr.f32.gmra.mxu0 %v64_v23  ;;  %1994 = vmatprep.subr.mxu0 %v411_v6 }
  0x2f   :  { %1914 = vmatprep.mubr.f32.mxu0 %v65_v24  ;;  %1995 = vmatpush3.msra.mxu0 %v411_v6 }
  0x30   :  { %1996 = vmatprep.subr.mxu0 %v410_v7 }
  0x31   :  { %1997 = vmatpush3.msra.mxu0 %v410_v7 }
  0x32   :  { %1915 = vmatmul.mubr.f32.gmra.mxu0 %v66_v25  ;;  %1998 = vmatprep.subr.mxu0 %v409_v8 }
  0x33   :  { %1917 = vmatprep.mubr.f32.mxu0 %v67_v26  ;;  %1999 = vmatpush3.msra.mxu0 %v409_v8 }
  0x34   :  { %2000 = vmatprep.subr.mxu0 %v408_v9 }
  0x35   :  { %2001 = vmatpush3.msra.mxu0 %v408_v9 }
  0x36   :  { %1918 = vmatmul.mubr.f32.gmra.mxu0 %v68_v27  ;;  %2002 = vmatprep.subr.mxu0 %v407_v10 }
  0x37   :  { %1920 = vmatprep.mubr.f32.mxu0 %v69_v28  ;;  %2003 = vmatpush3.msra.mxu0 %v407_v10 }
  0x38   :  { %2004 = vmatprep.subr.mxu0 %v406_v11 }
  0x39   :  { %2005 = vmatpush3.msra.mxu0 %v406_v11 }
  0x3a   :  { %1921 = vmatmul.mubr.f32.gmra.mxu0 %v70_v29  ;;  %2006 = vmatprep.subr.mxu0 %v405_v12 }
  0x3b   :  { %1923 = vmatprep.mubr.f32.mxu0 %v71_v30  ;;  %2007 = vmatpush3.msra.mxu0 %v405_v12 }
  0x3c   :  { %2008 = vmatprep.subr.mxu0 %v404_v13 }
  0x3d   :  { %2009 = vmatpush3.msra.mxu0 %v404_v13 }
  0x3e   :  { %1924 = vmatmul.mubr.f32.gmra.mxu0 %v72_v31  ;;  %2010 = vmatprep.subr.mxu0 %v403_v14 }
  0x3f   :  { %2011 = vmatpush3.msra.mxu0 %v403_v14 }
  0x40   :  { %2012 = vmatprep.subr.mxu0 %v402_v15 }
  0x41   :  { %2013 = vmatpush3.msra.mxu0 %v402_v15 }
  0xe2   :  { %v1904_v39 = vpop.f32.mrf.mxu0 }
  0xe4   :  { %v155_v40 = vpop.f32.mrf.mxu0 }
  0xe6   :  { %v1907_v41 = vpop.f32.mrf.mxu0 }
  0xe8   :  { %v165_v42 = vpop.f32.mrf.mxu0 }
  0xea   :  { %v1910_v43 = vpop.f32.mrf.mxu0 }
  0xec   :  { %v175_v44 = vpop.f32.mrf.mxu0 }
  0xee   :  { %v1913_v45 = vpop.f32.mrf.mxu0 }
  0xf0   :  { %v185_v46 = vpop.f32.mrf.mxu0 }
  0xf2   :  { %v1916_v47 = vpop.f32.mrf.mxu0 }
  0xf4   :  { %v195_v48 = vpop.f32.mrf.mxu0 }
  0xf6   :  { %v1919_v49 = vpop.f32.mrf.mxu0 }
  0xf8   :  { %v205_v50 = vpop.f32.mrf.mxu0 }
  0xfa   :  { %v1922_v51 = vpop.f32.mrf.mxu0 }
  0xfc   :  { %v215_v52 = vpop.f32.mrf.mxu0 }
  0xfe   :  { %v1925_v53 = vpop.f32.mrf.mxu0 }
  0xff   :  { %1926 = vmatprep.subr.mxu1 %v1925_v53 }
 0x100   :  { %v225_v54 = vpop.f32.mrf.mxu0  ;;  %1927 = vmatpush3.msra.mxu1 %v1925_v53 }
 0x101   :  { %1928 = vmatprep.subr.mxu1 %v225_v54 }
 0x102   :  { %1929 = vmatpush3.msra.mxu1 %v225_v54 }
 0x103   :  { %1930 = vmatprep.subr.mxu1 %v1922_v51 }
 0x104   :  { %1931 = vmatpush3.msra.mxu1 %v1922_v51 }
 0x105   :  { %1932 = vmatprep.subr.mxu1 %v215_v52 }
 0x106   :  { %1933 = vmatpush3.msra.mxu1 %v215_v52 }
 0x107   :  { %1934 = vmatprep.subr.mxu1 %v1919_v49 }
 0x108   :  { %1935 = vmatpush3.msra.mxu1 %v1919_v49 }
 0x109   :  { %1936 = vmatprep.subr.mxu1 %v205_v50 }
 0x10a   :  { %1937 = vmatpush3.msra.mxu1 %v205_v50 }
 0x10b   :  { %1938 = vmatprep.subr.mxu1 %v1916_v47 }
 0x10c   :  { %1939 = vmatpush3.msra.mxu1 %v1916_v47 }
 0x10d   :  { %1940 = vmatprep.subr.mxu1 %v195_v48 }
 0x10e   :  { %1941 = vmatpush3.msra.mxu1 %v195_v48 }
 0x10f   :  { %1942 = vmatprep.subr.mxu1 %v1913_v45 }
 0x110   :  { %1943 = vmatpush3.msra.mxu1 %v1913_v45 }
 0x111   :  { %1944 = vmatprep.subr.mxu1 %v185_v46 }
 0x112   :  { %1945 = vmatpush3.msra.mxu1 %v185_v46 }
 0x113   :  { %1946 = vmatprep.subr.mxu1 %v1910_v43 }
 0x114   :  { %1947 = vmatpush3.msra.mxu1 %v1910_v43 }
 0x115   :  { %1948 = vmatprep.subr.mxu1 %v175_v44 }
 0x116   :  { %1949 = vmatpush3.msra.mxu1 %v175_v44 }
 0x117   :  { %1950 = vmatprep.subr.mxu1 %v1907_v41 }
 0x118   :  { %1951 = vmatpush3.msra.mxu1 %v1907_v41 }
 0x119   :  { %1952 = vmatprep.subr.mxu1 %v165_v42 }
 0x11a   :  { %1953 = vmatpush3.msra.mxu1 %v165_v42 }
 0x11b   :  { %1954 = vmatprep.subr.mxu1 %v1904_v39 }
 0x11c   :  { %1955 = vmatpush3.msra.mxu1 %v1904_v39 }
 0x11d   :  { %1956 = vmatprep.subr.mxu1 %v155_v40 }
 0x11e   :  { %1957 = vmatpush3.msra.mxu1 %v155_v40 }
 0x11f   :  { %1959 = vmatmul.mubr.f32.vlgmr.msra.gmra.mxu1 %v2737_v55 }
 0x120   :  { %1961 = vmatprep.mubr.f32.mxu1 %v2742_v56 }
 0x123   :  { %1962 = vmatmul.mubr.f32.gmra.mxu1 %v2749_v57 }
 0x124   :  { %1964 = vmatprep.mubr.f32.mxu1 %v2754_v58 }
 0x127   :  { %1965 = vmatmul.mubr.f32.gmra.mxu1 %v2761_v59 }
 0x128   :  { %1967 = vmatprep.mubr.f32.mxu1 %v2766_v60 }
 0x12b   :  { %1968 = vmatmul.mubr.f32.gmra.mxu1 %v2773_v61 }
 0x12c   :  { %1970 = vmatprep.mubr.f32.mxu1 %v2778_v62 }
 0x12f   :  { %1971 = vmatmul.mubr.f32.gmra.mxu1 %v2785_v63 }
 0x130   :  { %1973 = vmatprep.mubr.f32.mxu1 %v2790_v0 }
 0x133   :  { %1974 = vmatmul.mubr.f32.gmra.mxu1 %v2797_v1 }
 0x134   :  { %1976 = vmatprep.mubr.f32.mxu1 %v2802_v2 }
 0x137   :  { %1977 = vmatmul.mubr.f32.gmra.mxu1 %v2809_v3 }
 0x138   :  { %1979 = vmatprep.mubr.f32.mxu1 %v2814_v4 }
 0x13b   :  { %1980 = vmatmul.mubr.f32.gmra.mxu1 %v2821_v5 }
 0x13c   :  { %2070 = vmatprep.mubr.f32.mxu1 %v2713_v32 }
 0x1df   :  { %v1960_v17 = vpop.f32.mrf.mxu1 }
 0x1e0   :  { %v313_v18 = vadd.f32 %v1960_v17, %v1577_v16 }
 0x1e1   :  { %v307_v19 = vpop.f32.mrf.mxu1 }
 0x1e2   :  { %v308_v20 = vadd.f32 %v1577_v16, %v307_v19  ;;  %v744_v19 = vld [vmem:[%s3180_s6 + $0x68] sm:$0xff] }
 0x1e3   :  { %v1963_v21 = vpop.f32.mrf.mxu1 }
 0x1e4   :  { %2406 = vtanh.f32 %v308_v20  ;;  %v323_v22 = vadd.f32 %v1963_v21, %v1577_v16  ;;  %v743_v20 = vld [vmem:[%s3180_s6 + $0x60] sm:$0xff]  ;;  %v742_v21 = vld [vmem:[%s3180_s6 + $0x58] sm:$0xff] }
 0x1e5   :  { %2408 = vtanh.f32 %v313_v18  ;;  %v317_v23 = vpop.f32.mrf.mxu1  ;;  %v745_v18 = vld [vmem:[%s3180_s6 + $0x70] sm:$0xff] }
 0x1e6   :  { %v318_v24 = vadd.f32 %v1577_v16, %v317_v23 }
 0x1e7   :  { %v1966_v25 = vpop.f32.mrf.mxu1 }
 0x1e8   :  { %2410 = vtanh.f32 %v318_v24  ;;  %v333_v26 = vadd.f32 %v1966_v25, %v1577_v16 }
 0x1e9   :  { %2412 = vtanh.f32 %v323_v22  ;;  %v327_v27 = vpop.f32.mrf.mxu1  ;;  %v741_v22 = vld [vmem:[%s3180_s6 + $0x50] sm:$0xff] }
 0x1ea   :  { %v328_v28 = vadd.f32 %v1577_v16, %v327_v27 }
 0x1eb   :  { %v1969_v29 = vpop.f32.mrf.mxu1 }
 0x1ec   :  { %2414 = vtanh.f32 %v328_v28  ;;  %v343_v30 = vadd.f32 %v1969_v29, %v1577_v16 }
 0x1ed   :  { %2416 = vtanh.f32 %v333_v26  ;;  %v337_v31 = vpop.f32.mrf.mxu1 }
 0x1ee   :  { %v338_v33 = vadd.f32 %v1577_v16, %v337_v31 }
 0x1ef   :  { %v1972_v34 = vpop.f32.mrf.mxu1 }
 0x1f0   :  { %2418 = vtanh.f32 %v338_v33  ;;  %v353_v36 = vadd.f32 %v1972_v34, %v1577_v16 }
 0x1f1   :  { %v2407_v35 = vpop.eup %2406  ;;  %2420 = vtanh.f32 %v343_v30  ;;  %v347_v37 = vpop.f32.mrf.mxu1 }
 0x1f2   :  { %v2409_v38 = vpop.eup %2408  ;;  %v348_v39 = vadd.f32 %v1577_v16, %v347_v37  ;;  %2014 = vmatprep.mubr.f32.mxu0 %v2407_v35 }
 0x1f3   :  { %v1975_v40 = vpop.f32.mrf.mxu1  ;;  %2015 = vmatmul.mubr.f32.vlgmr.msra.gmra.mxu0 %v2409_v38 }
 0x1f4   :  { %2422 = vtanh.f32 %v348_v39  ;;  %v363_v42 = vadd.f32 %v1975_v40, %v1577_v16  ;;  %v740_v40 = vld [vmem:[%s3180_s6 + $0x48] sm:$0xff] }
 0x1f5   :  { %v2411_v41 = vpop.eup %2410  ;;  %2424 = vtanh.f32 %v353_v36  ;;  %v357_v43 = vpop.f32.mrf.mxu1 }
 0x1f6   :  { %v2413_v44 = vpop.eup %2412  ;;  %v358_v45 = vadd.f32 %v1577_v16, %v357_v43  ;;  %2017 = vmatprep.mubr.f32.mxu0 %v2411_v41  ;;  %v739_v41 = vld [vmem:[%s3180_s6 + $0x40] sm:$0xff]  ;;  %v737_v43 = vld [vmem:[%s3180_s6 + $0x30] sm:$0xff] }
 0x1f7   :  { %v1978_v46 = vpop.f32.mrf.mxu1  ;;  %2018 = vmatmul.mubr.f32.gmra.mxu0 %v2413_v44  ;;  %v736_v44 = vld [vmem:[%s3180_s6 + $0x28] sm:$0xff] }
 0x1f8   :  { %2426 = vtanh.f32 %v358_v45  ;;  %v373_v48 = vadd.f32 %v1978_v46, %v1577_v16  ;;  %v735_v45 = vld [vmem:[%s3180_s6 + $0x20] sm:$0xff]  ;;  %v734_v46 = vld [vmem:[%s3180_s6 + $0x18] sm:$0xff] }
 0x1f9   :  { %v2415_v47 = vpop.eup %2414  ;;  %2428 = vtanh.f32 %v363_v42  ;;  %v367_v49 = vpop.f32.mrf.mxu1  ;;  %v738_v42 = vld [vmem:[%s3180_s6 + $0x38] sm:$0xff] }
 0x1fa   :  { %v2417_v50 = vpop.eup %2416  ;;  %v368_v51 = vadd.f32 %v1577_v16, %v367_v49  ;;  %2020 = vmatprep.mubr.f32.mxu0 %v2415_v47  ;;  %v733_v47 = vld [vmem:[%s3180_s6 + $0x10] sm:$0xff]  ;;  %v731_v49 = vld [vmem:[%s3180_s6] sm:$0xff] }
 0x1fb   :  { %v1981_v52 = vpop.f32.mrf.mxu1  ;;  %2021 = vmatmul.mubr.f32.gmra.mxu0 %v2417_v50  ;;  %v1578_v50 = vld [vmem:[%s3181_s5] ss:$0 sm:$0xff] }
 0x1fc   :  { %2430 = vtanh.f32 %v368_v51  ;;  %v383_v54 = vadd.f32 %v1981_v52, %v1577_v16 }
 0x1fd   :  { %v2419_v53 = vpop.eup %2418  ;;  %2432 = vtanh.f32 %v373_v48  ;;  %v377_v6 = vpop.f32.mrf.mxu1  ;;  %v732_v48 = vld [vmem:[%s3180_s6 + $0x8] sm:$0xff] }
 0x1fe   :  { %v2421_v7 = vpop.eup %2420  ;;  %v378_v8 = vadd.f32 %v1577_v16, %v377_v6  ;;  %2023 = vmatprep.mubr.f32.mxu0 %v2419_v53  ;;  %v746_v16 = vld [vmem:[%s3180_s6 + $0x78] sm:$0xff] }
 0x1ff   :  { %2024 = vmatmul.mubr.f32.gmra.mxu0 %v2421_v7  ;;  %2094 = vmatprep.subr.mxu0 %v746_v16 }
 0x200   :  { %2434 = vtanh.f32 %v378_v8  ;;  %2095 = vmatpush3.msra.mxu0 %v746_v16 }
 0x201   :  { %v2423_v9 = vpop.eup %2422  ;;  %2436 = vtanh.f32 %v383_v54  ;;  %2096 = vmatprep.subr.mxu0 %v745_v18 }
 0x202   :  { %v2425_v10 = vpop.eup %2424  ;;  %2026 = vmatprep.mubr.f32.mxu0 %v2423_v9  ;;  %2097 = vmatpush3.msra.mxu0 %v745_v18 }
 0x203   :  { %2027 = vmatmul.mubr.f32.gmra.mxu0 %v2425_v10  ;;  %2098 = vmatprep.subr.mxu0 %v744_v19 }
 0x204   :  { %2099 = vmatpush3.msra.mxu0 %v744_v19 }
 0x205   :  { %v2427_v11 = vpop.eup %2426  ;;  %2100 = vmatprep.subr.mxu0 %v743_v20 }
 0x206   :  { %v2429_v12 = vpop.eup %2428  ;;  %2029 = vmatprep.mubr.f32.mxu0 %v2427_v11  ;;  %2101 = vmatpush3.msra.mxu0 %v743_v20 }
 0x207   :  { %2030 = vmatmul.mubr.f32.gmra.mxu0 %v2429_v12  ;;  %2102 = vmatprep.subr.mxu0 %v742_v21 }
 0x208   :  { %2103 = vmatpush3.msra.mxu0 %v742_v21 }
 0x209   :  { %v2431_v13 = vpop.eup %2430  ;;  %2104 = vmatprep.subr.mxu0 %v741_v22 }
 0x20a   :  { %v2433_v14 = vpop.eup %2432  ;;  %2032 = vmatprep.mubr.f32.mxu0 %v2431_v13  ;;  %2105 = vmatpush3.msra.mxu0 %v741_v22 }
 0x20b   :  { %2033 = vmatmul.mubr.f32.gmra.mxu0 %v2433_v14  ;;  %2106 = vmatprep.subr.mxu0 %v740_v40 }
 0x20c   :  { %2107 = vmatpush3.msra.mxu0 %v740_v40 }
 0x20d   :  { %v2435_v15 = vpop.eup %2434  ;;  %2108 = vmatprep.subr.mxu0 %v739_v41 }
 0x20e   :  { %v2437_v17 = vpop.eup %2436  ;;  %2035 = vmatprep.mubr.f32.mxu0 %v2435_v15  ;;  %2109 = vmatpush3.msra.mxu0 %v739_v41 }
 0x20f   :  { %2036 = vmatmul.mubr.f32.gmra.mxu0 %v2437_v17  ;;  %2110 = vmatprep.subr.mxu0 %v738_v42 }
 0x210   :  { %2111 = vmatpush3.msra.mxu0 %v738_v42 }
 0x211   :  { %2112 = vmatprep.subr.mxu0 %v737_v43 }
 0x212   :  { %2113 = vmatpush3.msra.mxu0 %v737_v43 }
 0x213   :  { %2114 = vmatprep.subr.mxu0 %v736_v44 }
 0x214   :  { %2115 = vmatpush3.msra.mxu0 %v736_v44 }
 0x215   :  { %2116 = vmatprep.subr.mxu0 %v735_v45 }
 0x216   :  { %2117 = vmatpush3.msra.mxu0 %v735_v45 }
 0x217   :  { %2118 = vmatprep.subr.mxu0 %v734_v46 }
 0x218   :  { %2119 = vmatpush3.msra.mxu0 %v734_v46 }
 0x219   :  { %2120 = vmatprep.subr.mxu0 %v733_v47 }
 0x21a   :  { %2121 = vmatpush3.msra.mxu0 %v733_v47 }
 0x21b   :  { %2122 = vmatprep.subr.mxu0 %v732_v48 }
 0x21c   :  { %2123 = vmatpush3.msra.mxu0 %v732_v48 }
 0x21d   :  { %2124 = vmatprep.subr.mxu0 %v731_v49 }
 0x21e   :  { %2125 = vmatpush3.msra.mxu0 %v731_v49 }
 0x2b3   :  { %v2016_v23 = vpop.f32.mrf.mxu0 }
 0x2b5   :  { %v484_v24 = vpop.f32.mrf.mxu0 }
 0x2b7   :  { %v2019_v25 = vpop.f32.mrf.mxu0 }
 0x2b9   :  { %v494_v26 = vpop.f32.mrf.mxu0 }
 0x2bb   :  { %v2022_v27 = vpop.f32.mrf.mxu0 }
 0x2bd   :  { %v504_v28 = vpop.f32.mrf.mxu0 }
 0x2bf   :  { %v2025_v29 = vpop.f32.mrf.mxu0 }
 0x2c1   :  { %v514_v30 = vpop.f32.mrf.mxu0 }
 0x2c3   :  { %v2028_v31 = vpop.f32.mrf.mxu0 }
 0x2c5   :  { %v524_v33 = vpop.f32.mrf.mxu0 }
 0x2c7   :  { %v2031_v34 = vpop.f32.mrf.mxu0 }
 0x2c9   :  { %v534_v35 = vpop.f32.mrf.mxu0 }
 0x2cb   :  { %v2034_v36 = vpop.f32.mrf.mxu0 }
 0x2cd   :  { %v544_v37 = vpop.f32.mrf.mxu0 }
 0x2cf   :  { %v2037_v38 = vpop.f32.mrf.mxu0 }
 0x2d0   :  { %2038 = vmatprep.subr.mxu1 %v2037_v38 }
 0x2d1   :  { %v554_v39 = vpop.f32.mrf.mxu0  ;;  %2039 = vmatpush3.msra.mxu1 %v2037_v38 }
 0x2d2   :  { %2040 = vmatprep.subr.mxu1 %v554_v39 }
 0x2d3   :  { %2041 = vmatpush3.msra.mxu1 %v554_v39 }
 0x2d4   :  { %2042 = vmatprep.subr.mxu1 %v2034_v36 }
 0x2d5   :  { %2043 = vmatpush3.msra.mxu1 %v2034_v36 }
 0x2d6   :  { %2044 = vmatprep.subr.mxu1 %v544_v37 }
 0x2d7   :  { %2045 = vmatpush3.msra.mxu1 %v544_v37 }
 0x2d8   :  { %2046 = vmatprep.subr.mxu1 %v2031_v34 }
 0x2d9   :  { %2047 = vmatpush3.msra.mxu1 %v2031_v34 }
 0x2da   :  { %2048 = vmatprep.subr.mxu1 %v534_v35 }
 0x2db   :  { %2049 = vmatpush3.msra.mxu1 %v534_v35 }
 0x2dc   :  { %2050 = vmatprep.subr.mxu1 %v2028_v31 }
 0x2dd   :  { %2051 = vmatpush3.msra.mxu1 %v2028_v31 }
 0x2de   :  { %2052 = vmatprep.subr.mxu1 %v524_v33 }
 0x2df   :  { %2053 = vmatpush3.msra.mxu1 %v524_v33 }
 0x2e0   :  { %2054 = vmatprep.subr.mxu1 %v2025_v29 }
 0x2e1   :  { %2055 = vmatpush3.msra.mxu1 %v2025_v29 }
 0x2e2   :  { %2056 = vmatprep.subr.mxu1 %v514_v30 }
 0x2e3   :  { %2057 = vmatpush3.msra.mxu1 %v514_v30 }
 0x2e4   :  { %2058 = vmatprep.subr.mxu1 %v2022_v27 }
 0x2e5   :  { %2059 = vmatpush3.msra.mxu1 %v2022_v27 }
 0x2e6   :  { %2060 = vmatprep.subr.mxu1 %v504_v28 }
 0x2e7   :  { %2061 = vmatpush3.msra.mxu1 %v504_v28 }
 0x2e8   :  { %2062 = vmatprep.subr.mxu1 %v2019_v25 }
 0x2e9   :  { %2063 = vmatpush3.msra.mxu1 %v2019_v25 }
 0x2ea   :  { %2064 = vmatprep.subr.mxu1 %v494_v26 }
 0x2eb   :  { %2065 = vmatpush3.msra.mxu1 %v494_v26 }
 0x2ec   :  { %2066 = vmatprep.subr.mxu1 %v2016_v23 }
 0x2ed   :  { %2067 = vmatpush3.msra.mxu1 %v2016_v23 }
 0x2ee   :  { %2068 = vmatprep.subr.mxu1 %v484_v24 }
 0x2ef   :  { %2069 = vmatpush3.msra.mxu1 %v484_v24 }
 0x2f0   :  { %2071 = vmatmul.mubr.f32.vlgmr.msra.gmra.mxu1 %v2737_v55 }
 0x2f1   :  { %2073 = vmatprep.mubr.f32.mxu1 %v2742_v56 }
 0x2f4   :  { %2074 = vmatmul.mubr.f32.gmra.mxu1 %v2749_v57 }
 0x2f5   :  { %2076 = vmatprep.mubr.f32.mxu1 %v2754_v58 }
 0x2f8   :  { %2077 = vmatmul.mubr.f32.gmra.mxu1 %v2761_v59 }
 0x2f9   :  { %2079 = vmatprep.mubr.f32.mxu1 %v2766_v60 }
 0x2fc   :  { %2080 = vmatmul.mubr.f32.gmra.mxu1 %v2773_v61 }
 0x2fd   :  { %2082 = vmatprep.mubr.f32.mxu1 %v2778_v62 }
 0x300   :  { %2083 = vmatmul.mubr.f32.gmra.mxu1 %v2785_v63 }
 0x301   :  { %2085 = vmatprep.mubr.f32.mxu1 %v2790_v0 }
 0x304   :  { %2086 = vmatmul.mubr.f32.gmra.mxu1 %v2797_v1 }
 0x305   :  { %2088 = vmatprep.mubr.f32.mxu1 %v2802_v2 }
 0x308   :  { %2089 = vmatmul.mubr.f32.gmra.mxu1 %v2809_v3 }
 0x309   :  { %2091 = vmatprep.mubr.f32.mxu1 %v2814_v4 }
 0x30c   :  { %2092 = vmatmul.mubr.f32.gmra.mxu1 %v2821_v5 }
 0x30d   :  { %2182 = vmatprep.mubr.f32.mxu1 %v2713_v32 }
 0x3b0   :  { %v2072_v51 = vpop.f32.mrf.mxu1 }
 0x3b1   :  { %v642_v52 = vadd.f32 %v2072_v51, %v1578_v50 }
 0x3b2   :  { %v636_v53 = vpop.f32.mrf.mxu1 }
 0x3b3   :  { %v637_v54 = vadd.f32 %v1578_v50, %v636_v53  ;;  %v1073_v53 = vld [vmem:[%s3182_s8 + $0x68] sm:$0xff] }
 0x3b4   :  { %v2075_v6 = vpop.f32.mrf.mxu1 }
 0x3b5   :  { %2438 = vtanh.f32 %v637_v54  ;;  %v652_v7 = vadd.f32 %v2075_v6, %v1578_v50  ;;  %v1072_v54 = vld [vmem:[%s3182_s8 + $0x60] sm:$0xff]  ;;  %v1071_v6 = vld [vmem:[%s3182_s8 + $0x58] sm:$0xff] }
 0x3b6   :  { %2440 = vtanh.f32 %v642_v52  ;;  %v646_v8 = vpop.f32.mrf.mxu1  ;;  %v1074_v52 = vld [vmem:[%s3182_s8 + $0x70] sm:$0xff] }
 0x3b7   :  { %v647_v9 = vadd.f32 %v1578_v50, %v646_v8 }
 0x3b8   :  { %v2078_v10 = vpop.f32.mrf.mxu1 }
 0x3b9   :  { %2442 = vtanh.f32 %v647_v9  ;;  %v662_v11 = vadd.f32 %v2078_v10, %v1578_v50 }
 0x3ba   :  { %2444 = vtanh.f32 %v652_v7  ;;  %v656_v12 = vpop.f32.mrf.mxu1  ;;  %v1070_v7 = vld [vmem:[%s3182_s8 + $0x50] sm:$0xff] }
 0x3bb   :  { %v657_v13 = vadd.f32 %v1578_v50, %v656_v12 }
 0x3bc   :  { %v2081_v14 = vpop.f32.mrf.mxu1 }
 0x3bd   :  { %2446 = vtanh.f32 %v657_v13  ;;  %v672_v15 = vadd.f32 %v2081_v14, %v1578_v50 }
 0x3be   :  { %2448 = vtanh.f32 %v662_v11  ;;  %v666_v17 = vpop.f32.mrf.mxu1 }
 0x3bf   :  { %v667_v16 = vadd.f32 %v1578_v50, %v666_v17 }
 0x3c0   :  { %v2084_v18 = vpop.f32.mrf.mxu1 }
 0x3c1   :  { %2450 = vtanh.f32 %v667_v16  ;;  %v682_v20 = vadd.f32 %v2084_v18, %v1578_v50 }
 0x3c2   :  { %v2439_v19 = vpop.eup %2438  ;;  %2452 = vtanh.f32 %v672_v15  ;;  %v676_v21 = vpop.f32.mrf.mxu1 }
 0x3c3   :  { %v2441_v22 = vpop.eup %2440  ;;  %v677_v23 = vadd.f32 %v1578_v50, %v676_v21  ;;  %2126 = vmatprep.mubr.f32.mxu0 %v2439_v19 }
 0x3c4   :  { %v2087_v24 = vpop.f32.mrf.mxu1  ;;  %2127 = vmatmul.mubr.f32.vlgmr.msra.gmra.mxu0 %v2441_v22 }
 0x3c5   :  { %2454 = vtanh.f32 %v677_v23  ;;  %v692_v26 = vadd.f32 %v2087_v24, %v1578_v50 }
 0x3c6   :  { %v2443_v25 = vpop.eup %2442  ;;  %2456 = vtanh.f32 %v682_v20  ;;  %v686_v27 = vpop.f32.mrf.mxu1 }
 0x3c7   :  { %v2445_v28 = vpop.eup %2444  ;;  %v687_v29 = vadd.f32 %v1578_v50, %v686_v27  ;;  %2129 = vmatprep.mubr.f32.mxu0 %v2443_v25 }
 0x3c8   :  { %v2090_v30 = vpop.f32.mrf.mxu1  ;;  %2130 = vmatmul.mubr.f32.gmra.mxu0 %v2445_v28 }
 0x3c9   :  { %2458 = vtanh.f32 %v687_v29  ;;  %v702_v33 = vadd.f32 %v2090_v30, %v1578_v50 }
 0x3ca   :  { %v2447_v31 = vpop.eup %2446  ;;  %2460 = vtanh.f32 %v692_v26  ;;  %v696_v34 = vpop.f32.mrf.mxu1 }
 0x3cb   :  { %v2449_v35 = vpop.eup %2448  ;;  %v697_v36 = vadd.f32 %v1578_v50, %v696_v34  ;;  %2132 = vmatprep.mubr.f32.mxu0 %v2447_v31 }
 0x3cc   :  { %v2093_v37 = vpop.f32.mrf.mxu1  ;;  %2133 = vmatmul.mubr.f32.gmra.mxu0 %v2449_v35 }
 0x3cd   :  { %2462 = vtanh.f32 %v697_v36  ;;  %v712_v39 = vadd.f32 %v2093_v37, %v1578_v50 }
 0x3ce   :  { %v2451_v38 = vpop.eup %2450  ;;  %2464 = vtanh.f32 %v702_v33  ;;  %v706_v40 = vpop.f32.mrf.mxu1 }
 0x3cf   :  { %v2453_v41 = vpop.eup %2452  ;;  %v707_v42 = vadd.f32 %v1578_v50, %v706_v40  ;;  %2135 = vmatprep.mubr.f32.mxu0 %v2451_v38  ;;  %v1075_v50 = vld [vmem:[%s3182_s8 + $0x78] sm:$0xff] }
 0x3d0   :  { %2136 = vmatmul.mubr.f32.gmra.mxu0 %v2453_v41  ;;  %2206 = vmatprep.subr.mxu0 %v1075_v50 }
 0x3d1   :  { %2466 = vtanh.f32 %v707_v42  ;;  %2207 = vmatpush3.msra.mxu0 %v1075_v50 }
 0x3d2   :  { %v2455_v43 = vpop.eup %2454  ;;  %2468 = vtanh.f32 %v712_v39  ;;  %2208 = vmatprep.subr.mxu0 %v1074_v52 }
 0x3d3   :  { %v2457_v44 = vpop.eup %2456  ;;  %2138 = vmatprep.mubr.f32.mxu0 %v2455_v43  ;;  %2209 = vmatpush3.msra.mxu0 %v1074_v52 }
 0x3d4   :  { %2139 = vmatmul.mubr.f32.gmra.mxu0 %v2457_v44  ;;  %2210 = vmatprep.subr.mxu0 %v1073_v53 }
 0x3d5   :  { %2211 = vmatpush3.msra.mxu0 %v1073_v53 }
 0x3d6   :  { %v2459_v45 = vpop.eup %2458  ;;  %2212 = vmatprep.subr.mxu0 %v1072_v54 }
 0x3d7   :  { %v2461_v46 = vpop.eup %2460  ;;  %2141 = vmatprep.mubr.f32.mxu0 %v2459_v45  ;;  %2213 = vmatpush3.msra.mxu0 %v1072_v54 }
 0x3d8   :  { %2142 = vmatmul.mubr.f32.gmra.mxu0 %v2461_v46  ;;  %2214 = vmatprep.subr.mxu0 %v1071_v6 }
 0x3d9   :  { %2215 = vmatpush3.msra.mxu0 %v1071_v6 }
 0x3da   :  { %v2463_v47 = vpop.eup %2462  ;;  %2216 = vmatprep.subr.mxu0 %v1070_v7 }
 0x3db   :  { %v2465_v48 = vpop.eup %2464  ;;  %2144 = vmatprep.mubr.f32.mxu0 %v2463_v47  ;;  %2217 = vmatpush3.msra.mxu0 %v1070_v7 }
 0x3dc   :  { %2145 = vmatmul.mubr.f32.gmra.mxu0 %v2465_v48 }
 0x3de   :  { %v2467_v49 = vpop.eup %2466 }
 0x3df   :  { %v2469_v51 = vpop.eup %2468  ;;  %2147 = vmatprep.mubr.f32.mxu0 %v2467_v49 }
 0x3e0   :  { %2148 = vmatmul.mubr.f32.gmra.mxu0 %v2469_v51 }
 0x484   :  { %v2128_v8 = vpop.f32.mrf.mxu0 }
 0x486   :  { %v813_v9 = vpop.f32.mrf.mxu0 }
 0x488   :  { %v2131_v10 = vpop.f32.mrf.mxu0 }
 0x48a   :  { %v823_v11 = vpop.f32.mrf.mxu0 }
 0x48c   :  { %v2134_v12 = vpop.f32.mrf.mxu0 }
 0x48e   :  { %v833_v13 = vpop.f32.mrf.mxu0 }
 0x490   :  { %v2137_v14 = vpop.f32.mrf.mxu0 }
 0x492   :  { %v843_v15 = vpop.f32.mrf.mxu0 }
 0x494   :  { %v2140_v17 = vpop.f32.mrf.mxu0 }
 0x496   :  { %v853_v16 = vpop.f32.mrf.mxu0 }
 0x498   :  { %v2143_v18 = vpop.f32.mrf.mxu0 }
 0x49a   :  { %v863_v19 = vpop.f32.mrf.mxu0 }
 0x49c   :  { %v2146_v20 = vpop.f32.mrf.mxu0 }
 0x49e   :  { %v873_v21 = vpop.f32.mrf.mxu0 }
 0x4a0   :  { %v2149_v22 = vpop.f32.mrf.mxu0 }
 0x4a1   :  { %2150 = vmatprep.subr.mxu1 %v2149_v22 }
 0x4a2   :  { %v883_v23 = vpop.f32.mrf.mxu0  ;;  %2151 = vmatpush3.msra.mxu1 %v2149_v22  ;;  %v3014_v22 = vld [vmem:[%s3184_s10 + $0x60] sm:$0xff] }
 0x4a3   :  { %2152 = vmatprep.subr.mxu1 %v883_v23 }
 0x4a4   :  { %2153 = vmatpush3.msra.mxu1 %v883_v23  ;;  %v3021_v23 = vld [vmem:[%s3184_s10 + $0x58] sm:$0xff] }
 0x4a5   :  { %2154 = vmatprep.subr.mxu1 %v2146_v20 }
 0x4a6   :  { %2155 = vmatpush3.msra.mxu1 %v2146_v20  ;;  %v3000_v20 = vld [vmem:[%s3184_s10 + $0x70] sm:$0xff] }
 0x4a7   :  { %2156 = vmatprep.subr.mxu1 %v873_v21 }
 0x4a8   :  { %2157 = vmatpush3.msra.mxu1 %v873_v21  ;;  %v3007_v21 = vld [vmem:[%s3184_s10 + $0x68] sm:$0xff] }
 0x4a9   :  { %2158 = vmatprep.subr.mxu1 %v2143_v18 }
 0x4aa   :  { %2159 = vmatpush3.msra.mxu1 %v2143_v18 }
 0x4ab   :  { %2160 = vmatprep.subr.mxu1 %v863_v19 }
 0x4ac   :  { %2161 = vmatpush3.msra.mxu1 %v863_v19  ;;  %v2995_v19 = vld [vmem:[%s3184_s10 + $0x78] sm:$0xff] }
 0x4ad   :  { %2162 = vmatprep.subr.mxu1 %v2140_v17 }
 0x4ae   :  { %2163 = vmatpush3.msra.mxu1 %v2140_v17 }
 0x4af   :  { %2164 = vmatprep.subr.mxu1 %v853_v16 }
 0x4b0   :  { %2165 = vmatpush3.msra.mxu1 %v853_v16 }
 0x4b1   :  { %2166 = vmatprep.subr.mxu1 %v2137_v14 }
 0x4b2   :  { %2167 = vmatpush3.msra.mxu1 %v2137_v14 }
 0x4b3   :  { %2168 = vmatprep.subr.mxu1 %v843_v15 }
 0x4b4   :  { %2169 = vmatpush3.msra.mxu1 %v843_v15 }
 0x4b5   :  { %2170 = vmatprep.subr.mxu1 %v2134_v12 }
 0x4b6   :  { %2171 = vmatpush3.msra.mxu1 %v2134_v12 }
 0x4b7   :  { %2172 = vmatprep.subr.mxu1 %v833_v13 }
 0x4b8   :  { %2173 = vmatpush3.msra.mxu1 %v833_v13 }
 0x4b9   :  { %2174 = vmatprep.subr.mxu1 %v2131_v10 }
 0x4ba   :  { %2175 = vmatpush3.msra.mxu1 %v2131_v10 }
 0x4bb   :  { %2176 = vmatprep.subr.mxu1 %v823_v11 }
 0x4bc   :  { %2177 = vmatpush3.msra.mxu1 %v823_v11 }
 0x4bd   :  { %2178 = vmatprep.subr.mxu1 %v2128_v8 }
 0x4be   :  { %2179 = vmatpush3.msra.mxu1 %v2128_v8 }
 0x4bf   :  { %2180 = vmatprep.subr.mxu1 %v813_v9 }
 0x4c0   :  { %2181 = vmatpush3.msra.mxu1 %v813_v9 }
 0x4c1   :  { %2183 = vmatmul.mubr.f32.vlgmr.msra.gmra.mxu1 %v2737_v55  ;;  %v1069_v55 = vld [vmem:[%s3182_s8 + $0x48] sm:$0xff] }
 0x4c2   :  { %2185 = vmatprep.mubr.f32.mxu1 %v2742_v56  ;;  %2218 = vmatprep.subr.mxu0 %v1069_v55  ;;  %v1068_v56 = vld [vmem:[%s3182_s8 + $0x40] sm:$0xff] }
 0x4c3   :  { %2219 = vmatpush3.msra.mxu0 %v1069_v55  ;;  %v3028_v55 = vld [vmem:[%s3184_s10 + $0x50] sm:$0xff] }
 0x4c4   :  { %2220 = vmatprep.subr.mxu0 %v1068_v56 }
 0x4c5   :  { %2186 = vmatmul.mubr.f32.gmra.mxu1 %v2749_v57  ;;  %2221 = vmatpush3.msra.mxu0 %v1068_v56  ;;  %v1067_v57 = vld [vmem:[%s3182_s8 + $0x38] sm:$0xff] }
 0x4c6   :  { %2188 = vmatprep.mubr.f32.mxu1 %v2754_v58  ;;  %2222 = vmatprep.subr.mxu0 %v1067_v57  ;;  %v1065_v58 = vld [vmem:[%s3182_s8 + $0x28] sm:$0xff] }
 0x4c7   :  { %2223 = vmatpush3.msra.mxu0 %v1067_v57 }
 0x4c9   :  { %2189 = vmatmul.mubr.f32.gmra.mxu1 %v2761_v59  ;;  %v1064_v59 = vld [vmem:[%s3182_s8 + $0x20] sm:$0xff] }
 0x4ca   :  { %2191 = vmatprep.mubr.f32.mxu1 %v2766_v60  ;;  %v1063_v60 = vld [vmem:[%s3182_s8 + $0x18] sm:$0xff] }
 0x4cd   :  { %2192 = vmatmul.mubr.f32.gmra.mxu1 %v2773_v61  ;;  %v1062_v61 = vld [vmem:[%s3182_s8 + $0x10] sm:$0xff] }
 0x4ce   :  { %2194 = vmatprep.mubr.f32.mxu1 %v2778_v62  ;;  %v1061_v62 = vld [vmem:[%s3182_s8 + $0x8] sm:$0xff] }
 0x4d1   :  { %2195 = vmatmul.mubr.f32.gmra.mxu1 %v2785_v63  ;;  %v1060_v63 = vld [vmem:[%s3182_s8] sm:$0xff] }
 0x4d2   :  { %2197 = vmatprep.mubr.f32.mxu1 %v2790_v0  ;;  %v1579_v0 = vld [vmem:[%s3183_s7] ss:$0 sm:$0xff] }
 0x4d5   :  { %2198 = vmatmul.mubr.f32.gmra.mxu1 %v2797_v1 }
 0x4d6   :  { %2200 = vmatprep.mubr.f32.mxu1 %v2802_v2 }
 0x4d9   :  { %2201 = vmatmul.mubr.f32.gmra.mxu1 %v2809_v3 }
 0x4da   :  { %2203 = vmatprep.mubr.f32.mxu1 %v2814_v4 }
 0x4dd   :  { %2204 = vmatmul.mubr.f32.gmra.mxu1 %v2821_v5 }
 0x4de   :  { %2294 = vmatprep.mubr.f32.mxu1 %v2713_v32  ;;  %v1066_v32 = vld [vmem:[%s3182_s8 + $0x30] sm:$0xff] }
 0x4df   :  { %2224 = vmatprep.subr.mxu0 %v1066_v32 }
 0x4e0   :  { %2225 = vmatpush3.msra.mxu0 %v1066_v32 }
 0x4e1   :  { %2226 = vmatprep.subr.mxu0 %v1065_v58 }
 0x4e2   :  { %2227 = vmatpush3.msra.mxu0 %v1065_v58 }
 0x4e3   :  { %2228 = vmatprep.subr.mxu0 %v1064_v59 }
 0x4e4   :  { %2229 = vmatpush3.msra.mxu0 %v1064_v59 }
 0x4e5   :  { %2230 = vmatprep.subr.mxu0 %v1063_v60 }
 0x4e6   :  { %2231 = vmatpush3.msra.mxu0 %v1063_v60 }
 0x4e7   :  { %2232 = vmatprep.subr.mxu0 %v1062_v61 }
 0x4e8   :  { %2233 = vmatpush3.msra.mxu0 %v1062_v61 }
 0x4e9   :  { %2234 = vmatprep.subr.mxu0 %v1061_v62 }
 0x4ea   :  { %2235 = vmatpush3.msra.mxu0 %v1061_v62 }
 0x4eb   :  { %2236 = vmatprep.subr.mxu0 %v1060_v63 }
 0x4ec   :  { %2237 = vmatpush3.msra.mxu0 %v1060_v63 }
 0x4ed   :  { %2318 = vmatprep.subr.mxu0 %v2995_v19 }
 0x581   :  { %v2184_v1 = vpop.f32.mrf.mxu1 }
 0x582   :  { %v971_v2 = vadd.f32 %v2184_v1, %v1579_v0 }
 0x583   :  { %v965_v3 = vpop.f32.mrf.mxu1 }
 0x584   :  { %v966_v4 = vadd.f32 %v1579_v0, %v965_v3 }
 0x585   :  { %v2187_v5 = vpop.f32.mrf.mxu1 }
 0x586   :  { %2470 = vtanh.f32 %v966_v4  ;;  %v981_v24 = vadd.f32 %v2187_v5, %v1579_v0 }
 0x587   :  { %2472 = vtanh.f32 %v971_v2  ;;  %v975_v25 = vpop.f32.mrf.mxu1 }
 0x588   :  { %v976_v26 = vadd.f32 %v1579_v0, %v975_v25  ;;  %v2534_v25 = vld [vmem:[%s3177_s0 + $0x8] sm:$0xff] }
 0x589   :  { %v2190_v27 = vpop.f32.mrf.mxu1 }
 0x58a   :  { %2474 = vtanh.f32 %v976_v26  ;;  %v991_v28 = vadd.f32 %v2190_v27, %v1579_v0  ;;  %v2535_v26 = vld [vmem:[%s3177_s0 + $0x10] sm:$0xff]  ;;  %v2536_v27 = vld [vmem:[%s3177_s0 + $0x18] sm:$0xff] }
 0x58b   :  { %2476 = vtanh.f32 %v981_v24  ;;  %v985_v29 = vpop.f32.mrf.mxu1 }
 0x58c   :  { %v986_v30 = vadd.f32 %v1579_v0, %v985_v29  ;;  %v2538_v29 = vld [vmem:[%s3177_s0 + $0x28] sm:$0xff] }
 0x58d   :  { %v2193_v31 = vpop.f32.mrf.mxu1 }
 0x58e   :  { %2478 = vtanh.f32 %v986_v30  ;;  %v1001_v33 = vadd.f32 %v2193_v31, %v1579_v0  ;;  %v2539_v30 = vld [vmem:[%s3177_s0 + $0x30] sm:$0xff]  ;;  %v2540_v31 = vld [vmem:[%s3177_s0 + $0x38] sm:$0xff] }
 0x58f   :  { %2480 = vtanh.f32 %v991_v28  ;;  %v995_v34 = vpop.f32.mrf.mxu1  ;;  %v2537_v28 = vld [vmem:[%s3177_s0 + $0x20] sm:$0xff] }
 0x590   :  { %v996_v35 = vadd.f32 %v1579_v0, %v995_v34  ;;  %v2542_v34 = vld [vmem:[%s3177_s0 + $0x48] sm:$0xff] }
 0x591   :  { %v2196_v36 = vpop.f32.mrf.mxu1 }
 0x592   :  { %2482 = vtanh.f32 %v996_v35  ;;  %v1011_v38 = vadd.f32 %v2196_v36, %v1579_v0  ;;  %v2543_v35 = vld [vmem:[%s3177_s0 + $0x50] sm:$0xff]  ;;  %v2544_v36 = vld [vmem:[%s3177_s0 + $0x58] sm:$0xff] }
 0x593   :  { %v2471_v37 = vpop.eup %2470  ;;  %2484 = vtanh.f32 %v1001_v33  ;;  %v1005_v39 = vpop.f32.mrf.mxu1  ;;  %v2541_v33 = vld [vmem:[%s3177_s0 + $0x40] sm:$0xff] }
 0x594   :  { %v2473_v40 = vpop.eup %2472  ;;  %v1006_v41 = vadd.f32 %v1579_v0, %v1005_v39  ;;  %2238 = vmatprep.mubr.f32.mxu0 %v2471_v37  ;;  %v2545_v37 = vld [vmem:[%s3177_s0 + $0x60] sm:$0xff]  ;;  %v2547_v39 = vld [vmem:[%s3177_s0 + $0x70] sm:$0xff] }
 0x595   :  { %v2199_v42 = vpop.f32.mrf.mxu1  ;;  %2239 = vmatmul.mubr.f32.vlgmr.msra.gmra.mxu0 %v2473_v40  ;;  %v2548_v40 = vld [vmem:[%s3177_s0 + $0x78] sm:$0xff] }
 0x596   :  { %2486 = vtanh.f32 %v1006_v41  ;;  %v1021_v44 = vadd.f32 %v2199_v42, %v1579_v0  ;;  %2319 = vmatpush3.msra.mxu0 %v2995_v19  ;;  %v1398_v41 = vld [vmem:[%s3184_s10 + $0x48] sm:$0xff]  ;;  %v1397_v42 = vld [vmem:[%s3184_s10 + $0x40] sm:$0xff] }
 0x597   :  { %v2475_v43 = vpop.eup %2474  ;;  %2488 = vtanh.f32 %v1011_v38  ;;  %v1015_v45 = vpop.f32.mrf.mxu1  ;;  %2320 = vmatprep.subr.mxu0 %v3000_v20  ;;  %v2546_v38 = vld [vmem:[%s3177_s0 + $0x68] sm:$0xff] }
 0x598   :  { %v2477_v46 = vpop.eup %2476  ;;  %v1016_v47 = vadd.f32 %v1579_v0, %v1015_v45  ;;  %2241 = vmatprep.mubr.f32.mxu0 %v2475_v43  ;;  %2321 = vmatpush3.msra.mxu0 %v3000_v20  ;;  %v1396_v43 = vld [vmem:[%s3184_s10 + $0x38] sm:$0xff]  ;;  %v1394_v45 = vld [vmem:[%s3184_s10 + $0x28] sm:$0xff] }
 0x599   :  { %v2202_v48 = vpop.f32.mrf.mxu1  ;;  %2242 = vmatmul.mubr.f32.gmra.mxu0 %v2477_v46  ;;  %2322 = vmatprep.subr.mxu0 %v3007_v21  ;;  %v1393_v46 = vld [vmem:[%s3184_s10 + $0x20] sm:$0xff] }
 0x59a   :  { %2490 = vtanh.f32 %v1016_v47  ;;  %v1031_v51 = vadd.f32 %v2202_v48, %v1579_v0  ;;  %2323 = vmatpush3.msra.mxu0 %v3007_v21  ;;  %v1392_v47 = vld [vmem:[%s3184_s10 + $0x18] sm:$0xff]  ;;  %v1391_v48 = vld [vmem:[%s3184_s10 + $0x10] sm:$0xff] }
 0x59b   :  { %v2479_v49 = vpop.eup %2478  ;;  %2492 = vtanh.f32 %v1021_v44  ;;  %v1025_v50 = vpop.f32.mrf.mxu1  ;;  %2324 = vmatprep.subr.mxu0 %v3014_v22  ;;  %v1395_v44 = vld [vmem:[%s3184_s10 + $0x30] sm:$0xff] }
 0x59c   :  { %v2481_v52 = vpop.eup %2480  ;;  %v1026_v53 = vadd.f32 %v1579_v0, %v1025_v50  ;;  %2244 = vmatprep.mubr.f32.mxu0 %v2479_v49  ;;  %2325 = vmatpush3.msra.mxu0 %v3014_v22  ;;  %v1390_v49 = vld [vmem:[%s3184_s10 + $0x8] sm:$0xff]  ;;  %v1580_v50 = vld [vmem:[%s3185_s9] ss:$0 sm:$0xff] }
 0x59d   :  { %v2205_v54 = vpop.f32.mrf.mxu1  ;;  %2245 = vmatmul.mubr.f32.gmra.mxu0 %v2481_v52  ;;  %2326 = vmatprep.subr.mxu0 %v3021_v23 }
 0x59e   :  { %2494 = vtanh.f32 %v1026_v53  ;;  %v1041_v7 = vadd.f32 %v2205_v54, %v1579_v0  ;;  %2327 = vmatpush3.msra.mxu0 %v3021_v23 }
 0x59f   :  { %v2483_v6 = vpop.eup %2482  ;;  %2496 = vtanh.f32 %v1031_v51  ;;  %v1035_v8 = vpop.f32.mrf.mxu1  ;;  %2328 = vmatprep.subr.mxu0 %v3028_v55  ;;  %v1389_v51 = vld [vmem:[%s3184_s10] sm:$0xff] }
 0x5a0   :  { %v2485_v9 = vpop.eup %2484  ;;  %v1036_v10 = vadd.f32 %v1579_v0, %v1035_v8  ;;  %2247 = vmatprep.mubr.f32.mxu0 %v2483_v6  ;;  %2329 = vmatpush3.msra.mxu0 %v3028_v55 }
 0x5a1   :  { %2248 = vmatmul.mubr.f32.gmra.mxu0 %v2485_v9  ;;  %2330 = vmatprep.subr.mxu0 %v1398_v41 }
 0x5a2   :  { %2498 = vtanh.f32 %v1036_v10  ;;  %2331 = vmatpush3.msra.mxu0 %v1398_v41 }
 0x5a3   :  { %v2487_v11 = vpop.eup %2486  ;;  %2500 = vtanh.f32 %v1041_v7  ;;  %2332 = vmatprep.subr.mxu0 %v1397_v42 }
 0x5a4   :  { %v2489_v12 = vpop.eup %2488  ;;  %2250 = vmatprep.mubr.f32.mxu0 %v2487_v11  ;;  %2333 = vmatpush3.msra.mxu0 %v1397_v42 }
 0x5a5   :  { %2251 = vmatmul.mubr.f32.gmra.mxu0 %v2489_v12  ;;  %2334 = vmatprep.subr.mxu0 %v1396_v43 }
 0x5a6   :  { %2335 = vmatpush3.msra.mxu0 %v1396_v43 }
 0x5a7   :  { %v2491_v13 = vpop.eup %2490  ;;  %2336 = vmatprep.subr.mxu0 %v1395_v44 }
 0x5a8   :  { %v2493_v14 = vpop.eup %2492  ;;  %2253 = vmatprep.mubr.f32.mxu0 %v2491_v13  ;;  %2337 = vmatpush3.msra.mxu0 %v1395_v44 }
 0x5a9   :  { %2254 = vmatmul.mubr.f32.gmra.mxu0 %v2493_v14  ;;  %2338 = vmatprep.subr.mxu0 %v1394_v45 }
 0x5aa   :  { %2339 = vmatpush3.msra.mxu0 %v1394_v45 }
 0x5ab   :  { %v2495_v15 = vpop.eup %2494  ;;  %2340 = vmatprep.subr.mxu0 %v1393_v46 }
 0x5ac   :  { %v2497_v17 = vpop.eup %2496  ;;  %2256 = vmatprep.mubr.f32.mxu0 %v2495_v15  ;;  %2341 = vmatpush3.msra.mxu0 %v1393_v46 }
 0x5ad   :  { %2257 = vmatmul.mubr.f32.gmra.mxu0 %v2497_v17  ;;  %2342 = vmatprep.subr.mxu0 %v1392_v47 }
 0x5ae   :  { %2343 = vmatpush3.msra.mxu0 %v1392_v47 }
 0x5af   :  { %v2499_v16 = vpop.eup %2498  ;;  %2344 = vmatprep.subr.mxu0 %v1391_v48 }
 0x5b0   :  { %v2501_v18 = vpop.eup %2500  ;;  %2259 = vmatprep.mubr.f32.mxu0 %v2499_v16  ;;  %2345 = vmatpush3.msra.mxu0 %v1391_v48 }
 0x5b1   :  { %2260 = vmatmul.mubr.f32.gmra.mxu0 %v2501_v18  ;;  %2346 = vmatprep.subr.mxu0 %v1390_v49 }
 0x5b2   :  { %2347 = vmatpush3.msra.mxu0 %v1390_v49 }
 0x5b3   :  { %2348 = vmatprep.subr.mxu0 %v1389_v51 }
 0x5b4   :  { %2349 = vmatpush3.msra.mxu0 %v1389_v51 }
 0x655   :  { %v2240_v56 = vpop.f32.mrf.mxu0 }
 0x657   :  { %v1142_v57 = vpop.f32.mrf.mxu0 }
 0x659   :  { %v2243_v32 = vpop.f32.mrf.mxu0 }
 0x65b   :  { %v1152_v58 = vpop.f32.mrf.mxu0 }
 0x65d   :  { %v2246_v59 = vpop.f32.mrf.mxu0 }
 0x65f   :  { %v1162_v60 = vpop.f32.mrf.mxu0 }
 0x661   :  { %v2249_v61 = vpop.f32.mrf.mxu0 }
 0x663   :  { %v1172_v62 = vpop.f32.mrf.mxu0 }
 0x665   :  { %v2252_v63 = vpop.f32.mrf.mxu0 }
 0x667   :  { %v1182_v0 = vpop.f32.mrf.mxu0 }
 0x669   :  { %v2255_v1 = vpop.f32.mrf.mxu0 }
 0x66b   :  { %v1192_v2 = vpop.f32.mrf.mxu0 }
 0x66d   :  { %v2258_v3 = vpop.f32.mrf.mxu0 }
 0x66f   :  { %v1202_v4 = vpop.f32.mrf.mxu0 }
 0x671   :  { %v2261_v5 = vpop.f32.mrf.mxu0 }
 0x672   :  { %2262 = vmatprep.subr.mxu1 %v2261_v5 }
 0x673   :  { %v1212_v24 = vpop.f32.mrf.mxu0  ;;  %2263 = vmatpush3.msra.mxu1 %v2261_v5 }
 0x674   :  { %2264 = vmatprep.subr.mxu1 %v1212_v24 }
 0x675   :  { %2265 = vmatpush3.msra.mxu1 %v1212_v24 }
 0x676   :  { %2266 = vmatprep.subr.mxu1 %v2258_v3 }
 0x677   :  { %2267 = vmatpush3.msra.mxu1 %v2258_v3 }
 0x678   :  { %2268 = vmatprep.subr.mxu1 %v1202_v4 }
 0x679   :  { %2269 = vmatpush3.msra.mxu1 %v1202_v4 }
 0x67a   :  { %2270 = vmatprep.subr.mxu1 %v2255_v1 }
 0x67b   :  { %2271 = vmatpush3.msra.mxu1 %v2255_v1 }
 0x67c   :  { %2272 = vmatprep.subr.mxu1 %v1192_v2 }
 0x67d   :  { %2273 = vmatpush3.msra.mxu1 %v1192_v2 }
 0x67e   :  { %2274 = vmatprep.subr.mxu1 %v2252_v63 }
 0x67f   :  { %2275 = vmatpush3.msra.mxu1 %v2252_v63 }
 0x680   :  { %2276 = vmatprep.subr.mxu1 %v1182_v0 }
 0x681   :  { %2277 = vmatpush3.msra.mxu1 %v1182_v0 }
 0x682   :  { %2278 = vmatprep.subr.mxu1 %v2249_v61 }
 0x683   :  { %2279 = vmatpush3.msra.mxu1 %v2249_v61 }
 0x684   :  { %2280 = vmatprep.subr.mxu1 %v1172_v62 }
 0x685   :  { %2281 = vmatpush3.msra.mxu1 %v1172_v62 }
 0x686   :  { %2282 = vmatprep.subr.mxu1 %v2246_v59 }
 0x687   :  { %2283 = vmatpush3.msra.mxu1 %v2246_v59 }
 0x688   :  { %2284 = vmatprep.subr.mxu1 %v1162_v60 }
 0x689   :  { %2285 = vmatpush3.msra.mxu1 %v1162_v60 }
 0x68a   :  { %2286 = vmatprep.subr.mxu1 %v2243_v32 }
 0x68b   :  { %2287 = vmatpush3.msra.mxu1 %v2243_v32 }
 0x68c   :  { %2288 = vmatprep.subr.mxu1 %v1152_v58 }
 0x68d   :  { %2289 = vmatpush3.msra.mxu1 %v1152_v58 }
 0x68e   :  { %2290 = vmatprep.subr.mxu1 %v2240_v56 }
 0x68f   :  { %2291 = vmatpush3.msra.mxu1 %v2240_v56 }
 0x690   :  { %2292 = vmatprep.subr.mxu1 %v1142_v57 }
 0x691   :  { %2293 = vmatpush3.msra.mxu1 %v1142_v57 }
 0x692   :  { %2295 = vmatmul.mubr.f32.vlgmr.msra.gmra.mxu1 %v2534_v25  ;;  %2374 = vmatprep.subr.mxu1 %v2995_v19 }
 0x693   :  { %2297 = vmatprep.mubr.f32.mxu1 %v2535_v26  ;;  %2390 = vmatpush3.msra.mxu1 %v2995_v19 }
 0x694   :  { %2375 = vmatprep.subr.mxu1 %v3000_v20 }
 0x695   :  { %2391 = vmatpush3.msra.mxu1 %v3000_v20 }
 0x696   :  { %2298 = vmatmul.mubr.f32.gmra.mxu1 %v2536_v27  ;;  %2376 = vmatprep.subr.mxu1 %v3007_v21 }
 0x697   :  { %2300 = vmatprep.mubr.f32.mxu1 %v2537_v28  ;;  %2392 = vmatpush3.msra.mxu1 %v3007_v21 }
 0x698   :  { %2377 = vmatprep.subr.mxu1 %v3014_v22 }
 0x699   :  { %2393 = vmatpush3.msra.mxu1 %v3014_v22 }
 0x69a   :  { %2301 = vmatmul.mubr.f32.gmra.mxu1 %v2538_v29  ;;  %2378 = vmatprep.subr.mxu1 %v3021_v23 }
 0x69b   :  { %2303 = vmatprep.mubr.f32.mxu1 %v2539_v30  ;;  %2394 = vmatpush3.msra.mxu1 %v3021_v23 }
 0x69c   :  { %2379 = vmatprep.subr.mxu1 %v3028_v55 }
 0x69d   :  { %2395 = vmatpush3.msra.mxu1 %v3028_v55 }
 0x69e   :  { %2304 = vmatmul.mubr.f32.gmra.mxu1 %v2540_v31  ;;  %2380 = vmatprep.subr.mxu1 %v1398_v41 }
 0x69f   :  { %2306 = vmatprep.mubr.f32.mxu1 %v2541_v33  ;;  %2396 = vmatpush3.msra.mxu1 %v1398_v41 }
 0x6a0   :  { %2381 = vmatprep.subr.mxu1 %v1397_v42 }
 0x6a1   :  { %2397 = vmatpush3.msra.mxu1 %v1397_v42 }
 0x6a2   :  { %2307 = vmatmul.mubr.f32.gmra.mxu1 %v2542_v34  ;;  %2382 = vmatprep.subr.mxu1 %v1396_v43 }
 0x6a3   :  { %2309 = vmatprep.mubr.f32.mxu1 %v2543_v35  ;;  %2398 = vmatpush3.msra.mxu1 %v1396_v43 }
 0x6a4   :  { %2383 = vmatprep.subr.mxu1 %v1395_v44 }
 0x6a5   :  { %2399 = vmatpush3.msra.mxu1 %v1395_v44 }
 0x6a6   :  { %2310 = vmatmul.mubr.f32.gmra.mxu1 %v2544_v36  ;;  %2384 = vmatprep.subr.mxu1 %v1394_v45  ;;  %v1581_v36 = vld [vmem:[%s3186_s11] ss:$0 sm:$0xff] }
 0x6a7   :  { %2312 = vmatprep.mubr.f32.mxu1 %v2545_v37  ;;  %2400 = vmatpush3.msra.mxu1 %v1394_v45 }
 0x6a8   :  { %2385 = vmatprep.subr.mxu1 %v1393_v46 }
 0x6a9   :  { %2401 = vmatpush3.msra.mxu1 %v1393_v46 }
 0x6aa   :  { %2313 = vmatmul.mubr.f32.gmra.mxu1 %v2546_v38  ;;  %2386 = vmatprep.subr.mxu1 %v1392_v47 }
 0x6ab   :  { %2315 = vmatprep.mubr.f32.mxu1 %v2547_v39  ;;  %2402 = vmatpush3.msra.mxu1 %v1392_v47 }
 0x6ac   :  { %2387 = vmatprep.subr.mxu1 %v1391_v48 }
 0x6ad   :  { %2403 = vmatpush3.msra.mxu1 %v1391_v48 }
 0x6ae   :  { %2316 = vmatmul.mubr.f32.gmra.mxu1 %v2548_v40  ;;  %2388 = vmatprep.subr.mxu1 %v1390_v49 }
 0x6af   :  { %2404 = vmatpush3.msra.mxu1 %v1390_v49 }
 0x6b0   :  { %2389 = vmatprep.subr.mxu1 %v1389_v51 }
 0x6b1   :  { %2405 = vmatpush3.msra.mxu1 %v1389_v51 }
 0x752   :  { %v2296_v52 = vpop.f32.mrf.mxu1 }
 0x753   :  { %v1300_v53 = vadd.f32 %v2296_v52, %v1580_v50 }
 0x754   :  { %v1294_v54 = vpop.f32.mrf.mxu1 }
 0x755   :  { %v1295_v6 = vadd.f32 %v1580_v50, %v1294_v54 }
 0x756   :  { %v2299_v7 = vpop.f32.mrf.mxu1 }
 0x757   :  { %2502 = vtanh.f32 %v1295_v6  ;;  %v1310_v8 = vadd.f32 %v2299_v7, %v1580_v50 }
 0x758   :  { %2504 = vtanh.f32 %v1300_v53  ;;  %v1304_v9 = vpop.f32.mrf.mxu1 }
 0x759   :  { %v1305_v10 = vadd.f32 %v1580_v50, %v1304_v9 }
 0x75a   :  { %v2302_v11 = vpop.f32.mrf.mxu1 }
 0x75b   :  { %2506 = vtanh.f32 %v1305_v10  ;;  %v1320_v12 = vadd.f32 %v2302_v11, %v1580_v50 }
 0x75c   :  { %2508 = vtanh.f32 %v1310_v8  ;;  %v1314_v13 = vpop.f32.mrf.mxu1 }
 0x75d   :  { %v1315_v14 = vadd.f32 %v1580_v50, %v1314_v13 }
 0x75e   :  { %v2305_v15 = vpop.f32.mrf.mxu1 }
 0x75f   :  { %2510 = vtanh.f32 %v1315_v14  ;;  %v1330_v17 = vadd.f32 %v2305_v15, %v1580_v50 }
 0x760   :  { %2512 = vtanh.f32 %v1320_v12  ;;  %v1324_v16 = vpop.f32.mrf.mxu1 }
 0x761   :  { %v1325_v18 = vadd.f32 %v1580_v50, %v1324_v16 }
 0x762   :  { %v2308_v19 = vpop.f32.mrf.mxu1 }
 0x763   :  { %2514 = vtanh.f32 %v1325_v18  ;;  %v1340_v21 = vadd.f32 %v2308_v19, %v1580_v50 }
 0x764   :  { %v2503_v20 = vpop.eup %2502  ;;  %2516 = vtanh.f32 %v1330_v17  ;;  %v1334_v22 = vpop.f32.mrf.mxu1 }
 0x765   :  { %v2505_v23 = vpop.eup %2504  ;;  %v1335_v55 = vadd.f32 %v1580_v50, %v1334_v22  ;;  %2350 = vmatprep.mubr.f32.mxu0 %v2503_v20 }
 0x766   :  { %v2311_v56 = vpop.f32.mrf.mxu1  ;;  %2351 = vmatmul.mubr.f32.vlgmr.msra.gmra.mxu0 %v2505_v23 }
 0x767   :  { %2518 = vtanh.f32 %v1335_v55  ;;  %v1350_v32 = vadd.f32 %v2311_v56, %v1580_v50 }
 0x768   :  { %v2507_v57 = vpop.eup %2506  ;;  %2520 = vtanh.f32 %v1340_v21  ;;  %v1344_v58 = vpop.f32.mrf.mxu1 }
 0x769   :  { %v2509_v59 = vpop.eup %2508  ;;  %v1345_v60 = vadd.f32 %v1580_v50, %v1344_v58  ;;  %2353 = vmatprep.mubr.f32.mxu0 %v2507_v57 }
 0x76a   :  { %v2314_v61 = vpop.f32.mrf.mxu1  ;;  %2354 = vmatmul.mubr.f32.gmra.mxu0 %v2509_v59 }
 0x76b   :  { %2522 = vtanh.f32 %v1345_v60  ;;  %v1360_v63 = vadd.f32 %v2314_v61, %v1580_v50 }
 0x76c   :  { %v2511_v62 = vpop.eup %2510  ;;  %2524 = vtanh.f32 %v1350_v32  ;;  %v1354_v0 = vpop.f32.mrf.mxu1 }
 0x76d   :  { %v2513_v1 = vpop.eup %2512  ;;  %v1355_v2 = vadd.f32 %v1580_v50, %v1354_v0  ;;  %2356 = vmatprep.mubr.f32.mxu0 %v2511_v62 }
 0x76e   :  { %v2317_v3 = vpop.f32.mrf.mxu1  ;;  %2357 = vmatmul.mubr.f32.gmra.mxu0 %v2513_v1 }
 0x76f   :  { %2526 = vtanh.f32 %v1355_v2  ;;  %v1370_v5 = vadd.f32 %v2317_v3, %v1580_v50 }
 0x770   :  { %v2515_v4 = vpop.eup %2514  ;;  %2528 = vtanh.f32 %v1360_v63  ;;  %v1364_v24 = vpop.f32.mrf.mxu1 }
 0x771   :  { %v2517_v25 = vpop.eup %2516  ;;  %v1365_v26 = vadd.f32 %v1580_v50, %v1364_v24  ;;  %2359 = vmatprep.mubr.f32.mxu0 %v2515_v4 }
 0x772   :  { %2360 = vmatmul.mubr.f32.gmra.mxu0 %v2517_v25 }
 0x773   :  { %2530 = vtanh.f32 %v1365_v26 }
 0x774   :  { %v2519_v27 = vpop.eup %2518  ;;  %2532 = vtanh.f32 %v1370_v5 }
 0x775   :  { %v2521_v28 = vpop.eup %2520  ;;  %2362 = vmatprep.mubr.f32.mxu1 %v2519_v27 }
 0x776   :  { %2363 = vmatmul.mubr.f32.vlgmr.msra.gmra.mxu1 %v2521_v28 }
 0x778   :  { %v2523_v29 = vpop.eup %2522 }
 0x779   :  { %v2525_v30 = vpop.eup %2524  ;;  %2365 = vmatprep.mubr.f32.mxu1 %v2523_v29 }
 0x77a   :  { %2366 = vmatmul.mubr.f32.gmra.mxu1 %v2525_v30 }
 0x77c   :  { %v2527_v31 = vpop.eup %2526 }
 0x77d   :  { %v2529_v33 = vpop.eup %2528  ;;  %2368 = vmatprep.mubr.f32.mxu1 %v2527_v31 }
 0x77e   :  { %2369 = vmatmul.mubr.f32.gmra.mxu1 %v2529_v33 }
 0x780   :  { %v2531_v34 = vpop.eup %2530 }
 0x781   :  { %v2533_v35 = vpop.eup %2532  ;;  %2371 = vmatprep.mubr.f32.mxu1 %v2531_v34 }
 0x782   :  { %2372 = vmatmul.mubr.f32.gmra.mxu1 %v2533_v35 }
 0x826   :  { %v2352_v37 = vpop.f32.mrf.mxu0 }
 0x827   :  { %v1484_v38 = vadd.f32 %v2352_v37, %v1581_v36 }
 0x828   :  { %v1478_v39 = vpop.f32.mrf.mxu0 }
 0x829   :  { %1558 = vst [vmem:[%s3187_s12 + $0x8] sm:$0xff] %v1484_v38  ;;  %v1479_v40 = vadd.f32 %v1581_v36, %v1478_v39 }
 0x82a   :  { %v2355_v41 = vpop.f32.mrf.mxu0 }
 0x82b   :  { %1557 = vst [vmem:[%s3187_s12] sm:$0xff] %v1479_v40  ;;  %v1494_v42 = vadd.f32 %v2355_v41, %v1581_v36 }
 0x82c   :  { %v1488_v43 = vpop.f32.mrf.mxu0 }
 0x82d   :  { %1560 = vst [vmem:[%s3187_s12 + $0x18] sm:$0xff] %v1494_v42  ;;  %v1489_v44 = vadd.f32 %v1581_v36, %v1488_v43 }
 0x82e   :  { %v2358_v45 = vpop.f32.mrf.mxu0 }
 0x82f   :  { %1559 = vst [vmem:[%s3187_s12 + $0x10] sm:$0xff] %v1489_v44  ;;  %v1504_v46 = vadd.f32 %v2358_v45, %v1581_v36 }
 0x830   :  { %v1498_v47 = vpop.f32.mrf.mxu0 }
 0x831   :  { %1562 = vst [vmem:[%s3187_s12 + $0x28] sm:$0xff] %v1504_v46  ;;  %v1499_v48 = vadd.f32 %v1581_v36, %v1498_v47 }
 0x832   :  { %v2361_v49 = vpop.f32.mrf.mxu0 }
 0x833   :  { %1561 = vst [vmem:[%s3187_s12 + $0x20] sm:$0xff] %v1499_v48  ;;  %v1514_v51 = vadd.f32 %v2361_v49, %v1581_v36 }
 0x834   :  { %v1508_v50 = vpop.f32.mrf.mxu0 }
 0x835   :  { %1564 = vst [vmem:[%s3187_s12 + $0x38] sm:$0xff] %v1514_v51  ;;  %v1509_v52 = vadd.f32 %v1581_v36, %v1508_v50 }
 0x836   :  { %v2364_v53 = vpop.f32.mrf.mxu1 }
 0x837   :  { %1563 = vst [vmem:[%s3187_s12 + $0x30] sm:$0xff] %v1509_v52  ;;  %v1524_v54 = vadd.f32 %v2364_v53, %v1581_v36 }
 0x838   :  { %v1518_v6 = vpop.f32.mrf.mxu1 }
 0x839   :  { %1566 = vst [vmem:[%s3187_s12 + $0x48] sm:$0xff] %v1524_v54  ;;  %v1519_v7 = vadd.f32 %v1581_v36, %v1518_v6 }
 0x83a   :  { %v2367_v8 = vpop.f32.mrf.mxu1 }
 0x83b   :  { %1565 = vst [vmem:[%s3187_s12 + $0x40] sm:$0xff] %v1519_v7  ;;  %v1534_v9 = vadd.f32 %v2367_v8, %v1581_v36 }
 0x83c   :  { %v1528_v10 = vpop.f32.mrf.mxu1 }
 0x83d   :  { %1568 = vst [vmem:[%s3187_s12 + $0x58] sm:$0xff] %v1534_v9  ;;  %v1529_v11 = vadd.f32 %v1581_v36, %v1528_v10 }
 0x83e   :  { %v2370_v12 = vpop.f32.mrf.mxu1 }
 0x83f   :  { %1567 = vst [vmem:[%s3187_s12 + $0x50] sm:$0xff] %v1529_v11  ;;  %v1544_v13 = vadd.f32 %v2370_v12, %v1581_v36 }
 0x840   :  { %v1538_v14 = vpop.f32.mrf.mxu1 }
 0x841   :  { %1570 = vst [vmem:[%s3187_s12 + $0x68] sm:$0xff] %v1544_v13  ;;  %v1539_v15 = vadd.f32 %v1581_v36, %v1538_v14 }
 0x842   :  { %v2373_v17 = vpop.f32.mrf.mxu1 }
 0x843   :  { %1569 = vst [vmem:[%s3187_s12 + $0x60] sm:$0xff] %v1539_v15  ;;  %v1554_v16 = vadd.f32 %v2373_v17, %v1581_v36 }
 0x844   :  { %v1548_v18 = vpop.f32.mrf.mxu1 }
 0x845   :  { %1572 = vst [vmem:[%s3187_s12 + $0x78] sm:$0xff] %v1554_v16  ;;  %v1549_v19 = vadd.f32 %v1581_v36, %v1548_v18 }
 0x847   :  { %1571 = vst [vmem:[%s3187_s12 + $0x70] sm:$0xff] %v1549_v19 }

</bundles_post_ra>
